<compile_context>
chip_gen: v7x
topology: tpu7x:2x2x1
jax: 0.10.0
libtpu: 0.0.40
codegen_flags: <defaults>
</compile_context>

<pallas_src>
import math

import jax
import jax.numpy as jnp
from jax import lax
from jax.experimental import pallas as pl
from jax.experimental.pallas import tpu as pltpu

TAU = 1.0
SUBSTEPS = 8        # fixed RK4 substeps per output interval
TIME_CHUNK = 8      # output time stamps handled per grid step
LANE = 128
SUBLANE = 8


def _round_up(x, m):
    return (x + m - 1) // m * m


def _ode_kernel(t_ref, wt_ref, h_ref, r0_ref, out_ref, r_carry):
    """Grid = (batch_tiles, time_chunks); chunk c writes C time stamps.

    t_ref   : SMEM (L_pad + 1,) extended stamps; interval l = [t[l], t[l+1]]
              (t[0] == t[1], so output index 0 is exactly r0; padded tail
               intervals have dt == 0 and are harmless).
    wt_ref  : VMEM (N_pad, N_pad)  W^T (zero padded)
    h_ref   : VMEM (TB, N_pad)     constant input for this batch tile
    r0_ref  : VMEM (TB, N_pad)     initial state for this batch tile
    out_ref : VMEM (C, TB, N_pad)  output block for this (batch, time) tile
    r_carry : VMEM (TB, N_pad)     state carried across time chunks
    """
    c = pl.program_id(1)
    C = out_ref.shape[0]

    @pl.when(c == 0)
    def _():
        r_carry[...] = r0_ref[...]

    # Hoisted constants: loaded into vregs once per grid invocation.
    wt = wt_ref[...]
    h = h_ref[...]
    inv_tau = jnp.float32(1.0 / TAU)
    inv_sub = jnp.float32(1.0 / SUBSTEPS)

    def drdt(r):
        u = jnp.dot(r, wt, preferred_element_type=jnp.float32) + h
        return (jnp.maximum(u, 0.0) - r) * inv_tau

    def time_step(j, r):
        l = c * C + j
        dt = (t_ref[l + 1] - t_ref[l]) * inv_sub
        half_dt = 0.5 * dt
        dt_6 = dt * jnp.float32(1.0 / 6.0)
        dt_3 = dt * jnp.float32(1.0 / 3.0)

        def substep(_, r):
            k1 = drdt(r)
            k2 = drdt(r + half_dt * k1)
            k3 = drdt(r + half_dt * k2)
            k4 = drdt(r + dt * k3)
            # Incremental accumulation keeps peak live vregs low.
            acc = r + dt_6 * k1
            acc = acc + dt_3 * k2
            acc = acc + dt_3 * k3
            acc = acc + dt_6 * k4
            return acc

        # Fully unrolled RK4 chain -> straight-line code for the LLO scheduler.
        r = lax.fori_loop(0, SUBSTEPS, substep, r, unroll=True)
        out_ref[j] = r          # lane-dense (TB, N_pad) store
        return r

    r_carry[...] = lax.fori_loop(0, C, time_step, r_carry[...])


def numerical_model_forward(W, h, r0, t, *, time_chunk=TIME_CHUNK):
    """Pallas equivalent of NumericalModel.forward with constant input h.

    Args:
      W : (N, N) recurrent weights.
      h : (..., N) constant external input (non-callable case).
      r0: scalar or (..., N) initial state (broadcast against h).
      t : 0-d end time, or 1-d tensor of time stamps (first element = t0).

    Returns:
      (r, t) mirroring the torch module:
        if t.ndim == 1: r has shape (L, ..., N)
        if t.ndim == 0: r has shape (..., N)   (state at time t, starting at 0)
    """
    W = jnp.asarray(W, jnp.float32)
    N = W.shape[0]
    assert W.shape == (N, N)

    t = jnp.asarray(t, jnp.float32)
    if t.ndim == 0:
        _t = jnp.stack([jnp.zeros((), jnp.float32), t])
    elif t.ndim == 1:
        _t = t
    else:
        raise ValueError("t must be a one or zero dimensional tensor")
    L = int(_t.shape[0])
    assert L >= 1

    h = jnp.asarray(h, jnp.float32)
    assert h.shape[-1] == N
    r0 = jnp.asarray(r0, jnp.float32)
    r0b, h0 = jnp.broadcast_arrays(r0, h)          # mirrors torch.broadcast_tensors
    batch_shape = r0b.shape[:-1]
    B = math.prod(batch_shape) if batch_shape else 1
    r0_2d = r0b.reshape(B, N)
    h_2d = h0.reshape(B, N)

    # --- pad to TPU-friendly tiles: lane = 128, f32 sublane = 8 -------------
    N_pad = _round_up(N, LANE)
    B_pad = _round_up(B, SUBLANE)
    if B_pad > LANE:
        B_pad = _round_up(B_pad, LANE)
        TB = LANE                                   # batch tile (megacore-shardable)
    else:
        TB = B_pad
    n_btiles = B_pad // TB

    C = max(1, min(int(time_chunk), L))             # time stamps per grid step
    num_chunks = pl.cdiv(L, C)
    L_pad = num_chunks * C

    wt_p = jnp.zeros((N_pad, N_pad), jnp.float32).at[:N, :N].set(W.T)
    h_p = jnp.zeros((B_pad, N_pad), jnp.float32).at[:B, :N].set(h_2d)
    r0_p = jnp.zeros((B_pad, N_pad), jnp.float32).at[:B, :N].set(r0_2d)

    # Extended time stamps: interval l integrates from t_ext[l] to t_ext[l+1].
    # t_ext[0] == t_ext[1] == t[0]  (so out[0] == r0); padded tail has dt == 0.
    if L_pad > L:
        t_padded = jnp.concatenate(
            [_t, jnp.full((L_pad - L,), _t[-1], jnp.float32)])
    else:
        t_padded = _t
    t_ext = jnp.concatenate([_t[:1], t_padded])

    out = pl.pallas_call(
        _ode_kernel,
        out_shape=jax.ShapeDtypeStruct((L_pad, B_pad, N_pad), jnp.float32),
        grid=(n_btiles, num_chunks),
        in_specs=[
            pl.BlockSpec(memory_space=pltpu.MemorySpace.SMEM),          # t_ext
            pl.BlockSpec((N_pad, N_pad), lambda b, c: (0, 0)),          # W^T
            pl.BlockSpec((TB, N_pad), lambda b, c: (b, 0)),             # h
            pl.BlockSpec((TB, N_pad), lambda b, c: (b, 0)),             # r0
        ],
        out_specs=pl.BlockSpec((C, TB, N_pad), lambda b, c: (c, b, 0)),
        scratch_shapes=[pltpu.VMEM((TB, N_pad), jnp.float32)],
        compiler_params=pltpu.CompilerParams(
            # batch tiles independent -> megacore on v7x; time carried -> sequential
            dimension_semantics=("parallel", "arbitrary")),
    )(t_ext, wt_p, h_p, r0_p)

    out = out[:L, :B, :N].reshape((L,) + tuple(batch_shape) + (N,))
    if t.ndim == 0:
        return out[-1], t
    return out, t


def _reference_forward(W, h, r0, t):
    """Pure-JAX reference (same fixed-step RK4 discretization)."""
    W = jnp.asarray(W, jnp.float32)
    r0b, h0 = jnp.broadcast_arrays(jnp.asarray(r0, jnp.float32),
                                   jnp.asarray(h, jnp.float32))
    wt = W.T

    def drdt(r):
        return (jnp.maximum(r @ wt + h0, 0.0) - r) / TAU

    def interval(r, pair):
        t0, t1 = pair
        dt = (t1 - t0) / SUBSTEPS

        def substep(r, _):
            k1 = drdt(r)
            k2 = drdt(r + 0.5 * dt * k1)
            k3 = drdt(r + 0.5 * dt * k2)
            k4 = drdt(r + dt * k3)
            return r + (dt / 6.0) * (k1 + 2 * k2 + 2 * k3 + k4), None

        r, _ = lax.scan(substep, r, None, length=SUBSTEPS)
        return r, r

    _, rs = lax.scan(interval, r0b, (t[:-1], t[1:]))
    return jnp.concatenate([r0b[None], rs], axis=0)


if __name__ == "__main__":
    key = jax.random.PRNGKey(0)
    k_w, k_h, k_r = jax.random.split(key, 3)

    N = 32   # neurons
    B = 4    # batch
    L = 8    # number of time stamps

    # Stable recurrent weights (spectral radius well below 1).
    W = 0.5 * jax.random.normal(k_w, (N, N), jnp.float32) / jnp.sqrt(N)
    h = jax.random.normal(k_h, (B, N), jnp.float32)
    r0 = 0.1 * jax.random.normal(k_r, (B, N), jnp.float32)
    t = jnp.linspace(0.0, 2.0, L).astype(jnp.float32)

    r_ref = _reference_forward(W, h, r0, t)

    # 1) single-chunk path (entire time loop fused into one grid step)
    r, t_out = numerical_model_forward(W, h, r0, t)
    r = jax.block_until_ready(r)
    assert r.shape == (L, B, N)
    assert jnp.allclose(r, r_ref, rtol=1e-4, atol=1e-5), "mismatch vs JAX reference"

    # 2) multi-chunk path (exercises time padding + VMEM carry across chunks)
    r2, _ = numerical_model_forward(W, h, r0, t, time_chunk=3)
    r2 = jax.block_until_ready(r2)
    assert jnp.allclose(r2, r_ref, rtol=1e-4, atol=1e-5), "chunked mismatch"

    # 3) scalar-t path (end time only, initial time 0)
    r_end, _ = numerical_model_forward(W, h, r0, jnp.float32(2.0))
    r_end = jax.block_until_ready(r_end)
    r_end_ref = _reference_forward(W, h, r0, jnp.array([0.0, 2.0], jnp.float32))[-1]
    assert r_end.shape == (B, N)
    assert jnp.allclose(r_end, r_end_ref, rtol=1e-4, atol=1e-5), "scalar-t mismatch"

    print("KERNEL_OK")
</pallas_src>

<mosaic_0001>
module attributes {stable_mosaic.version = 11 : i64} {
  func.func @_ode_kernel(%arg0: i32, %arg1: i32, %arg2: memref<9xf32, #tpu.memory_space<smem>>, %arg3: memref<128x128xf32, #tpu.memory_space<vmem>>, %arg4: memref<8x128xf32, #tpu.memory_space<vmem>>, %arg5: memref<8x128xf32, #tpu.memory_space<vmem>>, %arg6: memref<8x8x128xf32, #tpu.memory_space<vmem>>, %arg7: memref<8x128xf32, #tpu.memory_space<vmem>>) attributes {dimension_semantics = [#tpu.dimension_semantics<parallel>, #tpu.dimension_semantics<arbitrary>], iteration_bounds = array<i64: 1, 1>, scalar_prefetch = 0 : i64, scratch_operands = 1 : i64, tpu.core_type = #tpu.core_type<tc>, window_params = [{transform_indices = @transform_0, window_bounds = array<i64: 9>}, {pipeline_mode = #tpu.pipeline_mode<synchronous>, transform_indices = @transform_1, window_bounds = array<i64: 128, 128>}, {transform_indices = @transform_2, window_bounds = array<i64: 8, 128>}, {transform_indices = @transform_3, window_bounds = array<i64: 8, 128>}, {transform_indices = @transform_4, window_bounds = array<i64: 8, 8, 128>}]} {
    %c0_i32 = arith.constant 0 : i32
    %0 = arith.cmpi eq, %arg1, %c0_i32 : i32
    %1 = arith.extui %0 : i1 to i32
    %c0_i32_0 = arith.constant 0 : i32
    %2 = arith.cmpi ne, %1, %c0_i32_0 : i32
    scf.if %2 {
      %c0_11 = arith.constant 0 : index
      %c0_12 = arith.constant 0 : index
      %9 = vector.load %arg5[%c0_11, %c0_12] : memref<8x128xf32, #tpu.memory_space<vmem>>, vector<8x128xf32>
      %c0_13 = arith.constant 0 : index
      %c0_14 = arith.constant 0 : index
      %10 = vector.load %arg7[%c0_13, %c0_14] : memref<8x128xf32, #tpu.memory_space<vmem>>, vector<8x128xf32>
      tpu.vector_store %arg7[%c0_13, %c0_14], %9 {strides = array<i32>} : memref<8x128xf32, #tpu.memory_space<vmem>>, vector<8x128xf32>,
    } else {
    }
    %c0 = arith.constant 0 : index
    %c0_1 = arith.constant 0 : index
    %3 = vector.load %arg3[%c0, %c0_1] : memref<128x128xf32, #tpu.memory_space<vmem>>, vector<128x128xf32>
    %c0_2 = arith.constant 0 : index
    %c0_3 = arith.constant 0 : index
    %4 = vector.load %arg4[%c0_2, %c0_3] : memref<8x128xf32, #tpu.memory_space<vmem>>, vector<8x128xf32>
    %c0_4 = arith.constant 0 : index
    %c0_5 = arith.constant 0 : index
    %5 = vector.load %arg7[%c0_4, %c0_5] : memref<8x128xf32, #tpu.memory_space<vmem>>, vector<8x128xf32>
    %cst = arith.constant 1.250000e-01 : f32
    %cst_6 = arith.constant 1.000000e+00 : f32
    %c0_i32_7 = arith.constant 0 : i32
    %c8_i32 = arith.constant 8 : i32
    %6 = arith.addi %c0_i32_7, %c8_i32 : i32
    %c1_i32 = arith.constant 1 : i32
    %7 = scf.for %arg8 = %c0_i32_7 to %6 step %c1_i32 iter_args(%arg9 = %5) -> (vector<8x128xf32>)  : i32 {
      %c8_i32_11 = arith.constant 8 : i32
      %9 = arith.muli %arg1, %c8_i32_11 : i32
      %10 = arith.addi %9, %arg8 : i32
      %c1_i32_12 = arith.constant 1 : i32
      %11 = arith.addi %10, %c1_i32_12 : i32
      %12 = arith.index_cast %11 : i32 to index
      %13 = memref.load %arg2[%12] : memref<9xf32, #tpu.memory_space<smem>>
      %14 = arith.index_cast %10 : i32 to index
      %15 = memref.load %arg2[%14] : memref<9xf32, #tpu.memory_space<smem>>
      %16 = arith.subf %13, %15 : f32
      %17 = arith.mulf %16, %cst : f32
      %cst_13 = arith.constant 5.000000e-01 : f32
      %18 = arith.mulf %cst_13, %17 : f32
      %cst_14 = arith.constant 0.166666672 : f32
      %19 = arith.mulf %17, %cst_14 : f32
      %cst_15 = arith.constant 0.333333343 : f32
      %20 = arith.mulf %17, %cst_15 : f32
      %c0_i32_16 = arith.constant 0 : i32
      %cst_17 = arith.constant dense<0.000000e+00> : vector<8x128xf32>
      %21 = tpu.matmul %arg9, %3, %cst_17 {dimension_numbers = #tpu.dot_dimension_numbers<[1], [0], [0], [1], [0, 0, 1, 1], [], []>} : vector<8x128xf32>, vector<128x128xf32>, vector<8x128xf32> -> vector<8x128xf32>
      %22 = arith.addf %21, %4 : vector<8x128xf32>
      %cst_18 = arith.constant 0.000000e+00 : f32
      %23 = vector.broadcast %cst_18 : f32 to vector<8x128xf32>
      %24 = arith.maximumf %22, %23 : vector<8x128xf32>
      %25 = arith.subf %24, %arg9 : vector<8x128xf32>
      %26 = vector.broadcast %cst_6 : f32 to vector<8x128xf32>
      %27 = arith.mulf %25, %26 : vector<8x128xf32>
      %28 = vector.broadcast %18 : f32 to vector<8x128xf32>
      %29 = arith.mulf %28, %27 : vector<8x128xf32>
      %30 = arith.addf %arg9, %29 : vector<8x128xf32>
      %cst_19 = arith.constant dense<0.000000e+00> : vector<8x128xf32>
      %31 = tpu.matmul %30, %3, %cst_19 {dimension_numbers = #tpu.dot_dimension_numbers<[1], [0], [0], [1], [0, 0, 1, 1], [], []>} : vector<8x128xf32>, vector<128x128xf32>, vector<8x128xf32> -> vector<8x128xf32>
      %32 = arith.addf %31, %4 : vector<8x128xf32>
      %cst_20 = arith.constant 0.000000e+00 : f32
      %33 = vector.broadcast %cst_20 : f32 to vector<8x128xf32>
      %34 = arith.maximumf %32, %33 : vector<8x128xf32>
      %35 = arith.subf %34, %30 : vector<8x128xf32>
      %36 = vector.broadcast %cst_6 : f32 to vector<8x128xf32>
      %37 = arith.mulf %35, %36 : vector<8x128xf32>
      %38 = vector.broadcast %18 : f32 to vector<8x128xf32>
      %39 = arith.mulf %38, %37 : vector<8x128xf32>
      %40 = arith.addf %arg9, %39 : vector<8x128xf32>
      %cst_21 = arith.constant dense<0.000000e+00> : vector<8x128xf32>
      %41 = tpu.matmul %40, %3, %cst_21 {dimension_numbers = #tpu.dot_dimension_numbers<[1], [0], [0], [1], [0, 0, 1, 1], [], []>} : vector<8x128xf32>, vector<128x128xf32>, vector<8x128xf32> -> vector<8x128xf32>
      %42 = arith.addf %41, %4 : vector<8x128xf32>
      %cst_22 = arith.constant 0.000000e+00 : f32
      %43 = vector.broadcast %cst_22 : f32 to vector<8x128xf32>
      %44 = arith.maximumf %42, %43 : vector<8x128xf32>
      %45 = arith.subf %44, %40 : vector<8x128xf32>
      %46 = vector.broadcast %cst_6 : f32 to vector<8x128xf32>
      %47 = arith.mulf %45, %46 : vector<8x128xf32>
      %48 = vector.broadcast %17 : f32 to vector<8x128xf32>
      %49 = arith.mulf %48, %47 : vector<8x128xf32>
      %50 = arith.addf %arg9, %49 : vector<8x128xf32>
      %cst_23 = arith.constant dense<0.000000e+00> : vector<8x128xf32>
      %51 = tpu.matmul %50, %3, %cst_23 {dimension_numbers = #tpu.dot_dimension_numbers<[1], [0], [0], [1], [0, 0, 1, 1], [], []>} : vector<8x128xf32>, vector<128x128xf32>, vector<8x128xf32> -> vector<8x128xf32>
      %52 = arith.addf %51, %4 : vector<8x128xf32>
      %cst_24 = arith.constant 0.000000e+00 : f32
      %53 = vector.broadcast %cst_24 : f32 to vector<8x128xf32>
      %54 = arith.maximumf %52, %53 : vector<8x128xf32>
      %55 = arith.subf %54, %50 : vector<8x128xf32>
      %56 = vector.broadcast %cst_6 : f32 to vector<8x128xf32>
      %57 = arith.mulf %55, %56 : vector<8x128xf32>
      %58 = vector.broadcast %19 : f32 to vector<8x128xf32>
      %59 = arith.mulf %58, %27 : vector<8x128xf32>
      %60 = arith.addf %arg9, %59 : vector<8x128xf32>
      %61 = vector.broadcast %20 : f32 to vector<8x128xf32>
      %62 = arith.mulf %61, %37 : vector<8x128xf32>
      %63 = arith.addf %60, %62 : vector<8x128xf32>
      %64 = vector.broadcast %20 : f32 to vector<8x128xf32>
      %65 = arith.mulf %64, %47 : vector<8x128xf32>
      %66 = arith.addf %63, %65 : vector<8x128xf32>
      %67 = vector.broadcast %19 : f32 to vector<8x128xf32>
      %68 = arith.mulf %67, %57 : vector<8x128xf32>
      %69 = arith.addf %66, %68 : vector<8x128xf32>
      %c1_i32_25 = arith.constant 1 : i32
      %cst_26 = arith.constant dense<0.000000e+00> : vector<8x128xf32>
      %70 = tpu.matmul %69, %3, %cst_26 {dimension_numbers = #tpu.dot_dimension_numbers<[1], [0], [0], [1], [0, 0, 1, 1], [], []>} : vector<8x128xf32>, vector<128x128xf32>, vector<8x128xf32> -> vector<8x128xf32>
      %71 = arith.addf %70, %4 : vector<8x128xf32>
      %cst_27 = arith.constant 0.000000e+00 : f32
      %72 = vector.broadcast %cst_27 : f32 to vector<8x128xf32>
      %73 = arith.maximumf %71, %72 : vector<8x128xf32>
      %74 = arith.subf %73, %69 : vector<8x128xf32>
      %75 = vector.broadcast %cst_6 : f32 to vector<8x128xf32>
      %76 = arith.mulf %74, %75 : vector<8x128xf32>
      %77 = vector.broadcast %18 : f32 to vector<8x128xf32>
      %78 = arith.mulf %77, %76 : vector<8x128xf32>
      %79 = arith.addf %69, %78 : vector<8x128xf32>
      %cst_28 = arith.constant dense<0.000000e+00> : vector<8x128xf32>
      %80 = tpu.matmul %79, %3, %cst_28 {dimension_numbers = #tpu.dot_dimension_numbers<[1], [0], [0], [1], [0, 0, 1, 1], [], []>} : vector<8x128xf32>, vector<128x128xf32>, vector<8x128xf32> -> vector<8x128xf32>
      %81 = arith.addf %80, %4 : vector<8x128xf32>
      %cst_29 = arith.constant 0.000000e+00 : f32
      %82 = vector.broadcast %cst_29 : f32 to vector<8x128xf32>
      %83 = arith.maximumf %81, %82 : vector<8x128xf32>
      %84 = arith.subf %83, %79 : vector<8x128xf32>
      %85 = vector.broadcast %cst_6 : f32 to vector<8x128xf32>
      %86 = arith.mulf %84, %85 : vector<8x128xf32>
      %87 = vector.broadcast %18 : f32 to vector<8x128xf32>
      %88 = arith.mulf %87, %86 : vector<8x128xf32>
      %89 = arith.addf %69, %88 : vector<8x128xf32>
      %cst_30 = arith.constant dense<0.000000e+00> : vector<8x128xf32>
      %90 = tpu.matmul %89, %3, %cst_30 {dimension_numbers = #tpu.dot_dimension_numbers<[1], [0], [0], [1], [0, 0, 1, 1], [], []>} : vector<8x128xf32>, vector<128x128xf32>, vector<8x128xf32> -> vector<8x128xf32>
      %91 = arith.addf %90, %4 : vector<8x128xf32>
      %cst_31 = arith.constant 0.000000e+00 : f32
      %92 = vector.broadcast %cst_31 : f32 to vector<8x128xf32>
      %93 = arith.maximumf %91, %92 : vector<8x128xf32>
      %94 = arith.subf %93, %89 : vector<8x128xf32>
      %95 = vector.broadcast %cst_6 : f32 to vector<8x128xf32>
      %96 = arith.mulf %94, %95 : vector<8x128xf32>
      %97 = vector.broadcast %17 : f32 to vector<8x128xf32>
      %98 = arith.mulf %97, %96 : vector<8x128xf32>
      %99 = arith.addf %69, %98 : vector<8x128xf32>
      %cst_32 = arith.constant dense<0.000000e+00> : vector<8x128xf32>
      %100 = tpu.matmul %99, %3, %cst_32 {dimension_numbers = #tpu.dot_dimension_numbers<[1], [0], [0], [1], [0, 0, 1, 1], [], []>} : vector<8x128xf32>, vector<128x128xf32>, vector<8x128xf32> -> vector<8x128xf32>
      %101 = arith.addf %100, %4 : vector<8x128xf32>
      %cst_33 = arith.constant 0.000000e+00 : f32
      %102 = vector.broadcast %cst_33 : f32 to vector<8x128xf32>
      %103 = arith.maximumf %101, %102 : vector<8x128xf32>
      %104 = arith.subf %103, %99 : vector<8x128xf32>
      %105 = vector.broadcast %cst_6 : f32 to vector<8x128xf32>
      %106 = arith.mulf %104, %105 : vector<8x128xf32>
      %107 = vector.broadcast %19 : f32 to vector<8x128xf32>
      %108 = arith.mulf %107, %76 : vector<8x128xf32>
      %109 = arith.addf %69, %108 : vector<8x128xf32>
      %110 = vector.broadcast %20 : f32 to vector<8x128xf32>
      %111 = arith.mulf %110, %86 : vector<8x128xf32>
      %112 = arith.addf %109, %111 : vector<8x128xf32>
      %113 = vector.broadcast %20 : f32 to vector<8x128xf32>
      %114 = arith.mulf %113, %96 : vector<8x128xf32>
      %115 = arith.addf %112, %114 : vector<8x128xf32>
      %116 = vector.broadcast %19 : f32 to vector<8x128xf32>
      %117 = arith.mulf %116, %106 : vector<8x128xf32>
      %118 = arith.addf %115, %117 : vector<8x128xf32>
      %c2_i32 = arith.constant 2 : i32
      %cst_34 = arith.constant dense<0.000000e+00> : vector<8x128xf32>
      %119 = tpu.matmul %118, %3, %cst_34 {dimension_numbers = #tpu.dot_dimension_numbers<[1], [0], [0], [1], [0, 0, 1, 1], [], []>} : vector<8x128xf32>, vector<128x128xf32>, vector<8x128xf32> -> vector<8x128xf32>
      %120 = arith.addf %119, %4 : vector<8x128xf32>
      %cst_35 = arith.constant 0.000000e+00 : f32
      %121 = vector.broadcast %cst_35 : f32 to vector<8x128xf32>
      %122 = arith.maximumf %120, %121 : vector<8x128xf32>
      %123 = arith.subf %122, %118 : vector<8x128xf32>
      %124 = vector.broadcast %cst_6 : f32 to vector<8x128xf32>
      %125 = arith.mulf %123, %124 : vector<8x128xf32>
      %126 = vector.broadcast %18 : f32 to vector<8x128xf32>
      %127 = arith.mulf %126, %125 : vector<8x128xf32>
      %128 = arith.addf %118, %127 : vector<8x128xf32>
      %cst_36 = arith.constant dense<0.000000e+00> : vector<8x128xf32>
      %129 = tpu.matmul %128, %3, %cst_36 {dimension_numbers = #tpu.dot_dimension_numbers<[1], [0], [0], [1], [0, 0, 1, 1], [], []>} : vector<8x128xf32>, vector<128x128xf32>, vector<8x128xf32> -> vector<8x128xf32>
      %130 = arith.addf %129, %4 : vector<8x128xf32>
      %cst_37 = arith.constant 0.000000e+00 : f32
      %131 = vector.broadcast %cst_37 : f32 to vector<8x128xf32>
      %132 = arith.maximumf %130, %131 : vector<8x128xf32>
      %133 = arith.subf %132, %128 : vector<8x128xf32>
      %134 = vector.broadcast %cst_6 : f32 to vector<8x128xf32>
      %135 = arith.mulf %133, %134 : vector<8x128xf32>
      %136 = vector.broadcast %18 : f32 to vector<8x128xf32>
      %137 = arith.mulf %136, %135 : vector<8x128xf32>
      %138 = arith.addf %118, %137 : vector<8x128xf32>
      %cst_38 = arith.constant dense<0.000000e+00> : vector<8x128xf32>
      %139 = tpu.matmul %138, %3, %cst_38 {dimension_numbers = #tpu.dot_dimension_numbers<[1], [0], [0], [1], [0, 0, 1, 1], [], []>} : vector<8x128xf32>, vector<128x128xf32>, vector<8x128xf32> -> vector<8x128xf32>
      %140 = arith.addf %139, %4 : vector<8x128xf32>
      %cst_39 = arith.constant 0.000000e+00 : f32
      %141 = vector.broadcast %cst_39 : f32 to vector<8x128xf32>
      %142 = arith.maximumf %140, %141 : vector<8x128xf32>
      %143 = arith.subf %142, %138 : vector<8x128xf32>
      %144 = vector.broadcast %cst_6 : f32 to vector<8x128xf32>
      %145 = arith.mulf %143, %144 : vector<8x128xf32>
      %146 = vector.broadcast %17 : f32 to vector<8x128xf32>
      %147 = arith.mulf %146, %145 : vector<8x128xf32>
      %148 = arith.addf %118, %147 : vector<8x128xf32>
      %cst_40 = arith.constant dense<0.000000e+00> : vector<8x128xf32>
      %149 = tpu.matmul %148, %3, %cst_40 {dimension_numbers = #tpu.dot_dimension_numbers<[1], [0], [0], [1], [0, 0, 1, 1], [], []>} : vector<8x128xf32>, vector<128x128xf32>, vector<8x128xf32> -> vector<8x128xf32>
      %150 = arith.addf %149, %4 : vector<8x128xf32>
      %cst_41 = arith.constant 0.000000e+00 : f32
      %151 = vector.broadcast %cst_41 : f32 to vector<8x128xf32>
      %152 = arith.maximumf %150, %151 : vector<8x128xf32>
      %153 = arith.subf %152, %148 : vector<8x128xf32>
      %154 = vector.broadcast %cst_6 : f32 to vector<8x128xf32>
      %155 = arith.mulf %153, %154 : vector<8x128xf32>
      %156 = vector.broadcast %19 : f32 to vector<8x128xf32>
      %157 = arith.mulf %156, %125 : vector<8x128xf32>
      %158 = arith.addf %118, %157 : vector<8x128xf32>
      %159 = vector.broadcast %20 : f32 to vector<8x128xf32>
      %160 = arith.mulf %159, %135 : vector<8x128xf32>
      %161 = arith.addf %158, %160 : vector<8x128xf32>
      %162 = vector.broadcast %20 : f32 to vector<8x128xf32>
      %163 = arith.mulf %162, %145 : vector<8x128xf32>
      %164 = arith.addf %161, %163 : vector<8x128xf32>
      %165 = vector.broadcast %19 : f32 to vector<8x128xf32>
      %166 = arith.mulf %165, %155 : vector<8x128xf32>
      %167 = arith.addf %164, %166 : vector<8x128xf32>
      %c3_i32 = arith.constant 3 : i32
      %cst_42 = arith.constant dense<0.000000e+00> : vector<8x128xf32>
      %168 = tpu.matmul %167, %3, %cst_42 {dimension_numbers = #tpu.dot_dimension_numbers<[1], [0], [0], [1], [0, 0, 1, 1], [], []>} : vector<8x128xf32>, vector<128x128xf32>, vector<8x128xf32> -> vector<8x128xf32>
      %169 = arith.addf %168, %4 : vector<8x128xf32>
      %cst_43 = arith.constant 0.000000e+00 : f32
      %170 = vector.broadcast %cst_43 : f32 to vector<8x128xf32>
      %171 = arith.maximumf %169, %170 : vector<8x128xf32>
      %172 = arith.subf %171, %167 : vector<8x128xf32>
      %173 = vector.broadcast %cst_6 : f32 to vector<8x128xf32>
      %174 = arith.mulf %172, %173 : vector<8x128xf32>
      %175 = vector.broadcast %18 : f32 to vector<8x128xf32>
      %176 = arith.mulf %175, %174 : vector<8x128xf32>
      %177 = arith.addf %167, %176 : vector<8x128xf32>
      %cst_44 = arith.constant dense<0.000000e+00> : vector<8x128xf32>
      %178 = tpu.matmul %177, %3, %cst_44 {dimension_numbers = #tpu.dot_dimension_numbers<[1], [0], [0], [1], [0, 0, 1, 1], [], []>} : vector<8x128xf32>, vector<128x128xf32>, vector<8x128xf32> -> vector<8x128xf32>
      %179 = arith.addf %178, %4 : vector<8x128xf32>
      %cst_45 = arith.constant 0.000000e+00 : f32
      %180 = vector.broadcast %cst_45 : f32 to vector<8x128xf32>
      %181 = arith.maximumf %179, %180 : vector<8x128xf32>
      %182 = arith.subf %181, %177 : vector<8x128xf32>
      %183 = vector.broadcast %cst_6 : f32 to vector<8x128xf32>
      %184 = arith.mulf %182, %183 : vector<8x128xf32>
      %185 = vector.broadcast %18 : f32 to vector<8x128xf32>
      %186 = arith.mulf %185, %184 : vector<8x128xf32>
      %187 = arith.addf %167, %186 : vector<8x128xf32>
      %cst_46 = arith.constant dense<0.000000e+00> : vector<8x128xf32>
      %188 = tpu.matmul %187, %3, %cst_46 {dimension_numbers = #tpu.dot_dimension_numbers<[1], [0], [0], [1], [0, 0, 1, 1], [], []>} : vector<8x128xf32>, vector<128x128xf32>, vector<8x128xf32> -> vector<8x128xf32>
      %189 = arith.addf %188, %4 : vector<8x128xf32>
      %cst_47 = arith.constant 0.000000e+00 : f32
      %190 = vector.broadcast %cst_47 : f32 to vector<8x128xf32>
      %191 = arith.maximumf %189, %190 : vector<8x128xf32>
      %192 = arith.subf %191, %187 : vector<8x128xf32>
      %193 = vector.broadcast %cst_6 : f32 to vector<8x128xf32>
      %194 = arith.mulf %192, %193 : vector<8x128xf32>
      %195 = vector.broadcast %17 : f32 to vector<8x128xf32>
      %196 = arith.mulf %195, %194 : vector<8x128xf32>
      %197 = arith.addf %167, %196 : vector<8x128xf32>
      %cst_48 = arith.constant dense<0.000000e+00> : vector<8x128xf32>
      %198 = tpu.matmul %197, %3, %cst_48 {dimension_numbers = #tpu.dot_dimension_numbers<[1], [0], [0], [1], [0, 0, 1, 1], [], []>} : vector<8x128xf32>, vector<128x128xf32>, vector<8x128xf32> -> vector<8x128xf32>
      %199 = arith.addf %198, %4 : vector<8x128xf32>
      %cst_49 = arith.constant 0.000000e+00 : f32
      %200 = vector.broadcast %cst_49 : f32 to vector<8x128xf32>
      %201 = arith.maximumf %199, %200 : vector<8x128xf32>
      %202 = arith.subf %201, %197 : vector<8x128xf32>
      %203 = vector.broadcast %cst_6 : f32 to vector<8x128xf32>
      %204 = arith.mulf %202, %203 : vector<8x128xf32>
      %205 = vector.broadcast %19 : f32 to vector<8x128xf32>
      %206 = arith.mulf %205, %174 : vector<8x128xf32>
      %207 = arith.addf %167, %206 : vector<8x128xf32>
      %208 = vector.broadcast %20 : f32 to vector<8x128xf32>
      %209 = arith.mulf %208, %184 : vector<8x128xf32>
      %210 = arith.addf %207, %209 : vector<8x128xf32>
      %211 = vector.broadcast %20 : f32 to vector<8x128xf32>
      %212 = arith.mulf %211, %194 : vector<8x128xf32>
      %213 = arith.addf %210, %212 : vector<8x128xf32>
      %214 = vector.broadcast %19 : f32 to vector<8x128xf32>
      %215 = arith.mulf %214, %204 : vector<8x128xf32>
      %216 = arith.addf %213, %215 : vector<8x128xf32>
      %c4_i32 = arith.constant 4 : i32
      %cst_50 = arith.constant dense<0.000000e+00> : vector<8x128xf32>
      %217 = tpu.matmul %216, %3, %cst_50 {dimension_numbers = #tpu.dot_dimension_numbers<[1], [0], [0], [1], [0, 0, 1, 1], [], []>} : vector<8x128xf32>, vector<128x128xf32>, vector<8x128xf32> -> vector<8x128xf32>
      %218 = arith.addf %217, %4 : vector<8x128xf32>
      %cst_51 = arith.constant 0.000000e+00 : f32
      %219 = vector.broadcast %cst_51 : f32 to vector<8x128xf32>
      %220 = arith.maximumf %218, %219 : vector<8x128xf32>
      %221 = arith.subf %220, %216 : vector<8x128xf32>
      %222 = vector.broadcast %cst_6 : f32 to vector<8x128xf32>
      %223 = arith.mulf %221, %222 : vector<8x128xf32>
      %224 = vector.broadcast %18 : f32 to vector<8x128xf32>
      %225 = arith.mulf %224, %223 : vector<8x128xf32>
      %226 = arith.addf %216, %225 : vector<8x128xf32>
      %cst_52 = arith.constant dense<0.000000e+00> : vector<8x128xf32>
      %227 = tpu.matmul %226, %3, %cst_52 {dimension_numbers = #tpu.dot_dimension_numbers<[1], [0], [0], [1], [0, 0, 1, 1], [], []>} : vector<8x128xf32>, vector<128x128xf32>, vector<8x128xf32> -> vector<8x128xf32>
      %228 = arith.addf %227, %4 : vector<8x128xf32>
      %cst_53 = arith.constant 0.000000e+00 : f32
      %229 = vector.broadcast %cst_53 : f32 to vector<8x128xf32>
      %230 = arith.maximumf %228, %229 : vector<8x128xf32>
      %231 = arith.subf %230, %226 : vector<8x128xf32>
      %232 = vector.broadcast %cst_6 : f32 to vector<8x128xf32>
      %233 = arith.mulf %231, %232 : vector<8x128xf32>
      %234 = vector.broadcast %18 : f32 to vector<8x128xf32>
      %235 = arith.mulf %234, %233 : vector<8x128xf32>
      %236 = arith.addf %216, %235 : vector<8x128xf32>
      %cst_54 = arith.constant dense<0.000000e+00> : vector<8x128xf32>
      %237 = tpu.matmul %236, %3, %cst_54 {dimension_numbers = #tpu.dot_dimension_numbers<[1], [0], [0], [1], [0, 0, 1, 1], [], []>} : vector<8x128xf32>, vector<128x128xf32>, vector<8x128xf32> -> vector<8x128xf32>
      %238 = arith.addf %237, %4 : vector<8x128xf32>
      %cst_55 = arith.constant 0.000000e+00 : f32
      %239 = vector.broadcast %cst_55 : f32 to vector<8x128xf32>
      %240 = arith.maximumf %238, %239 : vector<8x128xf32>
      %241 = arith.subf %240, %236 : vector<8x128xf32>
      %242 = vector.broadcast %cst_6 : f32 to vector<8x128xf32>
      %243 = arith.mulf %241, %242 : vector<8x128xf32>
      %244 = vector.broadcast %17 : f32 to vector<8x128xf32>
      %245 = arith.mulf %244, %243 : vector<8x128xf32>
      %246 = arith.addf %216, %245 : vector<8x128xf32>
      %cst_56 = arith.constant dense<0.000000e+00> : vector<8x128xf32>
      %247 = tpu.matmul %246, %3, %cst_56 {dimension_numbers = #tpu.dot_dimension_numbers<[1], [0], [0], [1], [0, 0, 1, 1], [], []>} : vector<8x128xf32>, vector<128x128xf32>, vector<8x128xf32> -> vector<8x128xf32>
      %248 = arith.addf %247, %4 : vector<8x128xf32>
      %cst_57 = arith.constant 0.000000e+00 : f32
      %249 = vector.broadcast %cst_57 : f32 to vector<8x128xf32>
      %250 = arith.maximumf %248, %249 : vector<8x128xf32>
      %251 = arith.subf %250, %246 : vector<8x128xf32>
      %252 = vector.broadcast %cst_6 : f32 to vector<8x128xf32>
      %253 = arith.mulf %251, %252 : vector<8x128xf32>
      %254 = vector.broadcast %19 : f32 to vector<8x128xf32>
      %255 = arith.mulf %254, %223 : vector<8x128xf32>
      %256 = arith.addf %216, %255 : vector<8x128xf32>
      %257 = vector.broadcast %20 : f32 to vector<8x128xf32>
      %258 = arith.mulf %257, %233 : vector<8x128xf32>
      %259 = arith.addf %256, %258 : vector<8x128xf32>
      %260 = vector.broadcast %20 : f32 to vector<8x128xf32>
      %261 = arith.mulf %260, %243 : vector<8x128xf32>
      %262 = arith.addf %259, %261 : vector<8x128xf32>
      %263 = vector.broadcast %19 : f32 to vector<8x128xf32>
      %264 = arith.mulf %263, %253 : vector<8x128xf32>
      %265 = arith.addf %262, %264 : vector<8x128xf32>
      %c5_i32 = arith.constant 5 : i32
      %cst_58 = arith.constant dense<0.000000e+00> : vector<8x128xf32>
      %266 = tpu.matmul %265, %3, %cst_58 {dimension_numbers = #tpu.dot_dimension_numbers<[1], [0], [0], [1], [0, 0, 1, 1], [], []>} : vector<8x128xf32>, vector<128x128xf32>, vector<8x128xf32> -> vector<8x128xf32>
      %267 = arith.addf %266, %4 : vector<8x128xf32>
      %cst_59 = arith.constant 0.000000e+00 : f32
      %268 = vector.broadcast %cst_59 : f32 to vector<8x128xf32>
      %269 = arith.maximumf %267, %268 : vector<8x128xf32>
      %270 = arith.subf %269, %265 : vector<8x128xf32>
      %271 = vector.broadcast %cst_6 : f32 to vector<8x128xf32>
      %272 = arith.mulf %270, %271 : vector<8x128xf32>
      %273 = vector.broadcast %18 : f32 to vector<8x128xf32>
      %274 = arith.mulf %273, %272 : vector<8x128xf32>
      %275 = arith.addf %265, %274 : vector<8x128xf32>
      %cst_60 = arith.constant dense<0.000000e+00> : vector<8x128xf32>
      %276 = tpu.matmul %275, %3, %cst_60 {dimension_numbers = #tpu.dot_dimension_numbers<[1], [0], [0], [1], [0, 0, 1, 1], [], []>} : vector<8x128xf32>, vector<128x128xf32>, vector<8x128xf32> -> vector<8x128xf32>
      %277 = arith.addf %276, %4 : vector<8x128xf32>
      %cst_61 = arith.constant 0.000000e+00 : f32
      %278 = vector.broadcast %cst_61 : f32 to vector<8x128xf32>
      %279 = arith.maximumf %277, %278 : vector<8x128xf32>
      %280 = arith.subf %279, %275 : vector<8x128xf32>
      %281 = vector.broadcast %cst_6 : f32 to vector<8x128xf32>
      %282 = arith.mulf %280, %281 : vector<8x128xf32>
      %283 = vector.broadcast %18 : f32 to vector<8x128xf32>
      %284 = arith.mulf %283, %282 : vector<8x128xf32>
      %285 = arith.addf %265, %284 : vector<8x128xf32>
      %cst_62 = arith.constant dense<0.000000e+00> : vector<8x128xf32>
      %286 = tpu.matmul %285, %3, %cst_62 {dimension_numbers = #tpu.dot_dimension_numbers<[1], [0], [0], [1], [0, 0, 1, 1], [], []>} : vector<8x128xf32>, vector<128x128xf32>, vector<8x128xf32> -> vector<8x128xf32>
      %287 = arith.addf %286, %4 : vector<8x128xf32>
      %cst_63 = arith.constant 0.000000e+00 : f32
      %288 = vector.broadcast %cst_63 : f32 to vector<8x128xf32>
      %289 = arith.maximumf %287, %288 : vector<8x128xf32>
      %290 = arith.subf %289, %285 : vector<8x128xf32>
      %291 = vector.broadcast %cst_6 : f32 to vector<8x128xf32>
      %292 = arith.mulf %290, %291 : vector<8x128xf32>
      %293 = vector.broadcast %17 : f32 to vector<8x128xf32>
      %294 = arith.mulf %293, %292 : vector<8x128xf32>
      %295 = arith.addf %265, %294 : vector<8x128xf32>
      %cst_64 = arith.constant dense<0.000000e+00> : vector<8x128xf32>
      %296 = tpu.matmul %295, %3, %cst_64 {dimension_numbers = #tpu.dot_dimension_numbers<[1], [0], [0], [1], [0, 0, 1, 1], [], []>} : vector<8x128xf32>, vector<128x128xf32>, vector<8x128xf32> -> vector<8x128xf32>
      %297 = arith.addf %296, %4 : vector<8x128xf32>
      %cst_65 = arith.constant 0.000000e+00 : f32
      %298 = vector.broadcast %cst_65 : f32 to vector<8x128xf32>
      %299 = arith.maximumf %297, %298 : vector<8x128xf32>
      %300 = arith.subf %299, %295 : vector<8x128xf32>
      %301 = vector.broadcast %cst_6 : f32 to vector<8x128xf32>
      %302 = arith.mulf %300, %301 : vector<8x128xf32>
      %303 = vector.broadcast %19 : f32 to vector<8x128xf32>
      %304 = arith.mulf %303, %272 : vector<8x128xf32>
      %305 = arith.addf %265, %304 : vector<8x128xf32>
      %306 = vector.broadcast %20 : f32 to vector<8x128xf32>
      %307 = arith.mulf %306, %282 : vector<8x128xf32>
      %308 = arith.addf %305, %307 : vector<8x128xf32>
      %309 = vector.broadcast %20 : f32 to vector<8x128xf32>
      %310 = arith.mulf %309, %292 : vector<8x128xf32>
      %311 = arith.addf %308, %310 : vector<8x128xf32>
      %312 = vector.broadcast %19 : f32 to vector<8x128xf32>
      %313 = arith.mulf %312, %302 : vector<8x128xf32>
      %314 = arith.addf %311, %313 : vector<8x128xf32>
      %c6_i32 = arith.constant 6 : i32
      %cst_66 = arith.constant dense<0.000000e+00> : vector<8x128xf32>
      %315 = tpu.matmul %314, %3, %cst_66 {dimension_numbers = #tpu.dot_dimension_numbers<[1], [0], [0], [1], [0, 0, 1, 1], [], []>} : vector<8x128xf32>, vector<128x128xf32>, vector<8x128xf32> -> vector<8x128xf32>
      %316 = arith.addf %315, %4 : vector<8x128xf32>
      %cst_67 = arith.constant 0.000000e+00 : f32
      %317 = vector.broadcast %cst_67 : f32 to vector<8x128xf32>
      %318 = arith.maximumf %316, %317 : vector<8x128xf32>
      %319 = arith.subf %318, %314 : vector<8x128xf32>
      %320 = vector.broadcast %cst_6 : f32 to vector<8x128xf32>
      %321 = arith.mulf %319, %320 : vector<8x128xf32>
      %322 = vector.broadcast %18 : f32 to vector<8x128xf32>
      %323 = arith.mulf %322, %321 : vector<8x128xf32>
      %324 = arith.addf %314, %323 : vector<8x128xf32>
      %cst_68 = arith.constant dense<0.000000e+00> : vector<8x128xf32>
      %325 = tpu.matmul %324, %3, %cst_68 {dimension_numbers = #tpu.dot_dimension_numbers<[1], [0], [0], [1], [0, 0, 1, 1], [], []>} : vector<8x128xf32>, vector<128x128xf32>, vector<8x128xf32> -> vector<8x128xf32>
      %326 = arith.addf %325, %4 : vector<8x128xf32>
      %cst_69 = arith.constant 0.000000e+00 : f32
      %327 = vector.broadcast %cst_69 : f32 to vector<8x128xf32>
      %328 = arith.maximumf %326, %327 : vector<8x128xf32>
      %329 = arith.subf %328, %324 : vector<8x128xf32>
      %330 = vector.broadcast %cst_6 : f32 to vector<8x128xf32>
      %331 = arith.mulf %329, %330 : vector<8x128xf32>
      %332 = vector.broadcast %18 : f32 to vector<8x128xf32>
      %333 = arith.mulf %332, %331 : vector<8x128xf32>
      %334 = arith.addf %314, %333 : vector<8x128xf32>
      %cst_70 = arith.constant dense<0.000000e+00> : vector<8x128xf32>
      %335 = tpu.matmul %334, %3, %cst_70 {dimension_numbers = #tpu.dot_dimension_numbers<[1], [0], [0], [1], [0, 0, 1, 1], [], []>} : vector<8x128xf32>, vector<128x128xf32>, vector<8x128xf32> -> vector<8x128xf32>
      %336 = arith.addf %335, %4 : vector<8x128xf32>
      %cst_71 = arith.constant 0.000000e+00 : f32
      %337 = vector.broadcast %cst_71 : f32 to vector<8x128xf32>
      %338 = arith.maximumf %336, %337 : vector<8x128xf32>
      %339 = arith.subf %338, %334 : vector<8x128xf32>
      %340 = vector.broadcast %cst_6 : f32 to vector<8x128xf32>
      %341 = arith.mulf %339, %340 : vector<8x128xf32>
      %342 = vector.broadcast %17 : f32 to vector<8x128xf32>
      %343 = arith.mulf %342, %341 : vector<8x128xf32>
      %344 = arith.addf %314, %343 : vector<8x128xf32>
      %cst_72 = arith.constant dense<0.000000e+00> : vector<8x128xf32>
      %345 = tpu.matmul %344, %3, %cst_72 {dimension_numbers = #tpu.dot_dimension_numbers<[1], [0], [0], [1], [0, 0, 1, 1], [], []>} : vector<8x128xf32>, vector<128x128xf32>, vector<8x128xf32> -> vector<8x128xf32>
      %346 = arith.addf %345, %4 : vector<8x128xf32>
      %cst_73 = arith.constant 0.000000e+00 : f32
      %347 = vector.broadcast %cst_73 : f32 to vector<8x128xf32>
      %348 = arith.maximumf %346, %347 : vector<8x128xf32>
      %349 = arith.subf %348, %344 : vector<8x128xf32>
      %350 = vector.broadcast %cst_6 : f32 to vector<8x128xf32>
      %351 = arith.mulf %349, %350 : vector<8x128xf32>
      %352 = vector.broadcast %19 : f32 to vector<8x128xf32>
      %353 = arith.mulf %352, %321 : vector<8x128xf32>
      %354 = arith.addf %314, %353 : vector<8x128xf32>
      %355 = vector.broadcast %20 : f32 to vector<8x128xf32>
      %356 = arith.mulf %355, %331 : vector<8x128xf32>
      %357 = arith.addf %354, %356 : vector<8x128xf32>
      %358 = vector.broadcast %20 : f32 to vector<8x128xf32>
      %359 = arith.mulf %358, %341 : vector<8x128xf32>
      %360 = arith.addf %357, %359 : vector<8x128xf32>
      %361 = vector.broadcast %19 : f32 to vector<8x128xf32>
      %362 = arith.mulf %361, %351 : vector<8x128xf32>
      %363 = arith.addf %360, %362 : vector<8x128xf32>
      %c7_i32 = arith.constant 7 : i32
      %cst_74 = arith.constant dense<0.000000e+00> : vector<8x128xf32>
      %364 = tpu.matmul %363, %3, %cst_74 {dimension_numbers = #tpu.dot_dimension_numbers<[1], [0], [0], [1], [0, 0, 1, 1], [], []>} : vector<8x128xf32>, vector<128x128xf32>, vector<8x128xf32> -> vector<8x128xf32>
      %365 = arith.addf %364, %4 : vector<8x128xf32>
      %cst_75 = arith.constant 0.000000e+00 : f32
      %366 = vector.broadcast %cst_75 : f32 to vector<8x128xf32>
      %367 = arith.maximumf %365, %366 : vector<8x128xf32>
      %368 = arith.subf %367, %363 : vector<8x128xf32>
      %369 = vector.broadcast %cst_6 : f32 to vector<8x128xf32>
      %370 = arith.mulf %368, %369 : vector<8x128xf32>
      %371 = vector.broadcast %18 : f32 to vector<8x128xf32>
      %372 = arith.mulf %371, %370 : vector<8x128xf32>
      %373 = arith.addf %363, %372 : vector<8x128xf32>
      %cst_76 = arith.constant dense<0.000000e+00> : vector<8x128xf32>
      %374 = tpu.matmul %373, %3, %cst_76 {dimension_numbers = #tpu.dot_dimension_numbers<[1], [0], [0], [1], [0, 0, 1, 1], [], []>} : vector<8x128xf32>, vector<128x128xf32>, vector<8x128xf32> -> vector<8x128xf32>
      %375 = arith.addf %374, %4 : vector<8x128xf32>
      %cst_77 = arith.constant 0.000000e+00 : f32
      %376 = vector.broadcast %cst_77 : f32 to vector<8x128xf32>
      %377 = arith.maximumf %375, %376 : vector<8x128xf32>
      %378 = arith.subf %377, %373 : vector<8x128xf32>
      %379 = vector.broadcast %cst_6 : f32 to vector<8x128xf32>
      %380 = arith.mulf %378, %379 : vector<8x128xf32>
      %381 = vector.broadcast %18 : f32 to vector<8x128xf32>
      %382 = arith.mulf %381, %380 : vector<8x128xf32>
      %383 = arith.addf %363, %382 : vector<8x128xf32>
      %cst_78 = arith.constant dense<0.000000e+00> : vector<8x128xf32>
      %384 = tpu.matmul %383, %3, %cst_78 {dimension_numbers = #tpu.dot_dimension_numbers<[1], [0], [0], [1], [0, 0, 1, 1], [], []>} : vector<8x128xf32>, vector<128x128xf32>, vector<8x128xf32> -> vector<8x128xf32>
      %385 = arith.addf %384, %4 : vector<8x128xf32>
      %cst_79 = arith.constant 0.000000e+00 : f32
      %386 = vector.broadcast %cst_79 : f32 to vector<8x128xf32>
      %387 = arith.maximumf %385, %386 : vector<8x128xf32>
      %388 = arith.subf %387, %383 : vector<8x128xf32>
      %389 = vector.broadcast %cst_6 : f32 to vector<8x128xf32>
      %390 = arith.mulf %388, %389 : vector<8x128xf32>
      %391 = vector.broadcast %17 : f32 to vector<8x128xf32>
      %392 = arith.mulf %391, %390 : vector<8x128xf32>
      %393 = arith.addf %363, %392 : vector<8x128xf32>
      %cst_80 = arith.constant dense<0.000000e+00> : vector<8x128xf32>
      %394 = tpu.matmul %393, %3, %cst_80 {dimension_numbers = #tpu.dot_dimension_numbers<[1], [0], [0], [1], [0, 0, 1, 1], [], []>} : vector<8x128xf32>, vector<128x128xf32>, vector<8x128xf32> -> vector<8x128xf32>
      %395 = arith.addf %394, %4 : vector<8x128xf32>
      %cst_81 = arith.constant 0.000000e+00 : f32
      %396 = vector.broadcast %cst_81 : f32 to vector<8x128xf32>
      %397 = arith.maximumf %395, %396 : vector<8x128xf32>
      %398 = arith.subf %397, %393 : vector<8x128xf32>
      %399 = vector.broadcast %cst_6 : f32 to vector<8x128xf32>
      %400 = arith.mulf %398, %399 : vector<8x128xf32>
      %401 = vector.broadcast %19 : f32 to vector<8x128xf32>
      %402 = arith.mulf %401, %370 : vector<8x128xf32>
      %403 = arith.addf %363, %402 : vector<8x128xf32>
      %404 = vector.broadcast %20 : f32 to vector<8x128xf32>
      %405 = arith.mulf %404, %380 : vector<8x128xf32>
      %406 = arith.addf %403, %405 : vector<8x128xf32>
      %407 = vector.broadcast %20 : f32 to vector<8x128xf32>
      %408 = arith.mulf %407, %390 : vector<8x128xf32>
      %409 = arith.addf %406, %408 : vector<8x128xf32>
      %410 = vector.broadcast %19 : f32 to vector<8x128xf32>
      %411 = arith.mulf %410, %400 : vector<8x128xf32>
      %412 = arith.addf %409, %411 : vector<8x128xf32>
      %413 = arith.index_cast %arg8 : i32 to index
      %c0_82 = arith.constant 0 : index
      %c0_83 = arith.constant 0 : index
      %414 = vector.load %arg6[%413, %c0_82, %c0_83] : memref<8x8x128xf32, #tpu.memory_space<vmem>>, vector<1x8x128xf32>
      %415 = vector.shape_cast %414 : vector<1x8x128xf32> to vector<8x128xf32>
      %416 = vector.shape_cast %412 : vector<8x128xf32> to vector<1x8x128xf32>
      tpu.vector_store %arg6[%413, %c0_82, %c0_83], %416 {strides = array<i32>} : memref<8x8x128xf32, #tpu.memory_space<vmem>>, vector<1x8x128xf32>,
      scf.yield %412 : vector<8x128xf32>
    }
    %c8_i32_8 = arith.constant 8 : i32
    %c0_9 = arith.constant 0 : index
    %c0_10 = arith.constant 0 : index
    %8 = vector.load %arg7[%c0_9, %c0_10] : memref<8x128xf32, #tpu.memory_space<vmem>>, vector<8x128xf32>
    tpu.vector_store %arg7[%c0_9, %c0_10], %7 {strides = array<i32>} : memref<8x128xf32, #tpu.memory_space<vmem>>, vector<8x128xf32>,
    return
  }
  func.func @transform_0(%arg0: i32, %arg1: i32) -> i32 {
    %c0_i32 = arith.constant 0 : i32
    %c0_i32_0 = arith.constant 0 : i32
    return %c0_i32 : i32
  }
  func.func @transform_1(%arg0: i32, %arg1: i32) -> (i32, i32) {
    %c0_i32 = arith.constant 0 : i32
    %c0_i32_0 = arith.constant 0 : i32
    %c0_i32_1 = arith.constant 0 : i32
    return %c0_i32, %c0_i32_0 : i32, i32
  }
  func.func @transform_2(%arg0: i32, %arg1: i32) -> (i32, i32) {
    %c0_i32 = arith.constant 0 : i32
    %c0_i32_0 = arith.constant 0 : i32
    return %arg0, %c0_i32 : i32, i32
  }
  func.func @transform_3(%arg0: i32, %arg1: i32) -> (i32, i32) {
    %c0_i32 = arith.constant 0 : i32
    %c0_i32_0 = arith.constant 0 : i32
    return %arg0, %c0_i32 : i32, i32
  }
  func.func @transform_4(%arg0: i32, %arg1: i32) -> (i32, i32, i32) {
    %c0_i32 = arith.constant 0 : i32
    %c0_i32_0 = arith.constant 0 : i32
    return %arg1, %arg0, %c0_i32 : i32, i32, i32
  }
}

</mosaic_0001>

<bundles_post_ra>
// kernel: tpu_custom_call.1
= control target key start
LH: loop header
LB: loop body
LE: loop exit
PB: predicated region body
PF: predicated region fallthrough
CT: control target
= control target key end

     0   :  { %9 = vsyncpa [#allocation6], 0  ;;  %s6018_s0 = inlined_call_operand.hbm [shape: f32[9], index: 0, kind: input, shape index: {}]   ;;  %s6019_s1 = inlined_call_operand.hbm [shape: f32[128,128], index: 1, kind: input, shape index: {}]   ;;  %s6020_s2 = inlined_call_operand.hbm [shape: f32[8,128], index: 2, kind: input, shape index: {}]   ;;  %s6021_s3 = inlined_call_operand.vmem [shape: f32[8,128], index: 3, kind: input, shape index: {}]   ;;  %s6022_s4 = inlined_call_operand.hbm [shape: f32[8,8,128], index: 4, kind: output, shape index: {}]  }
   0x1   :  { %10 = vsyncpa [#allocation4], 0 }
   0x2   :  { %11 = vsyncpa [#allocation9], 0 }
   0x3   :  { %12 = vsyncpa [#allocation5], 0  ;;  %s5007_s17 = scalar_lea.hbm %s6018_s0, 16 }
   0x4   :  { %p5008_p0 = scmp.ne.s32.totalorder %s6018_s0, %s5007_s17  ;;  %p5011_p1 = scmp.lt.u32.totalorder %s5007_s17, %s6018_s0 }
   0x6   :  { %p5013_p2 = pnand %p5011_p1, %p5008_p0 }
   0x8   :  { %5016 = shalt.err (!%p5013_p2)
}
   0x9   :  { %s5107_s22 = smov [#allocation3]   ;;  %s5108_s25 = smov [#allocation7]  }
   0xa   :  { %20 = dma.hbm_to_smem %s6018_s0, 16, %s5107_s22, [#allocation6]  }
   0xb   :  { %s26_s26 = sshll.u32 %s5108_s25, 4  ;;  %s5017_s29 = scalar_lea.hbm %s6019_s1, 2048  ;;  %s27_s26 = int_to_ptr.vmem [resolvable:$true] %s26_s26 }
   0xc   :  { %p5018_p3 = scmp.ne.s32.totalorder %s6019_s1, %s5017_s29  ;;  %p5021_p4 = scmp.lt.u32.totalorder %s5017_s29, %s6019_s1 }
   0xe   :  { %p5023_p5 = pnand %p5021_p4, %p5018_p3 }
  0x10   :  { %5026 = shalt.err (!%p5023_p5)
}
  0x11   :  { %s5027_s8 = scalar_lea.vmem %s27_s26, 2048  ;;  %p5032_p7 = scmp.lt.s32.totalorder %s27_s26, %s27_s26 }
  0x12   :  { %p5028_p6 = scmp.ne.s32.totalorder %s27_s26, %s5027_s8  ;;  %p5033_p8 = scmp.lt.s32.totalorder %s5027_s8, %s5027_s8 }
  0x14   :  { %p5034_p9 = por %p5033_p8, %p5032_p7 }
  0x16   :  { %p5035_p10 = pnand %p5034_p9, %p5028_p6 }
  0x18   :  { %5038 = shalt.err (!%p5035_p10)
}
  0x19   :  { %s5109_s0 = smov 128   ;;  %s5110_s9 = smov 8  }
  0x1a   :  { %32 = dma.hbm_to_vmem [thread:$0]  %s6019_s1, 2048, %s27_s26, [#allocation4], %s5109_s0, %s5109_s0, %s5110_s9  }
  0x1b   :  { %s5111_s12 = smov [#allocation8]   ;;  %s5039_s16 = scalar_lea.hbm %s6020_s2, 128 }
  0x1c   :  { %s39_s13 = sshll.u32 %s5111_s12, 4  ;;  %p5040_p11 = scmp.ne.s32.totalorder %s6020_s2, %s5039_s16  ;;  %s40_s13 = int_to_ptr.vmem [resolvable:$true] %s39_s13 }
  0x1d   :  { %p5043_p12 = scmp.lt.u32.totalorder %s5039_s16, %s6020_s2 }
  0x1f   :  { %p5045_p13 = pnand %p5043_p12, %p5040_p11 }
  0x21   :  { %5048 = shalt.err (!%p5045_p13)
}
  0x22   :  { %s5049_s21 = scalar_lea.vmem %s40_s13, 128  ;;  %p5054_p1 = scmp.lt.s32.totalorder %s40_s13, %s40_s13 }
  0x23   :  { %p5050_p0 = scmp.ne.s32.totalorder %s40_s13, %s5049_s21  ;;  %p5055_p2 = scmp.lt.s32.totalorder %s5049_s21, %s5049_s21 }
  0x25   :  { %p5056_p3 = por %p5055_p2, %p5054_p1 }
  0x27   :  { %p5057_p4 = pnand %p5056_p3, %p5050_p0 }
  0x29   :  { %5060 = shalt.err (!%p5057_p4)
}
  0x2a   :  { %42 = dma.hbm_to_vmem [thread:$0]  %s6020_s2, 128, %s40_s13, [#allocation9]  }
  0x2b   :  { %5091 = dma.done.wait [#allocation6], 16  }
  0x2c   :  { %5092 = vsyncadd [#allocation6], 4294967280 }
  0x2d   :  { %5093 = dma.done.wait [#allocation4], 2048  }
  0x2e   :  { %5094 = vsyncadd [#allocation4], 4294965248 }
  0x2f   :  { %5095 = dma.done.wait [#allocation9], 128  }
  0x30   :  { %5096 = vsyncadd [#allocation9], 4294967168 }
  0x31   :  { %54 = sfence }
  0x32   :  { %v59_v0 = vld [vmem:[%s6021_s3] sm:$0xff]   ;;  %v5183_v1 = vld [vmem:[#allocation7] sm:$0xff]  ;;  %v5185_v2 = vld [vmem:[#allocation7 + $0x8] sm:$0xff]  ;;  %s5219_s2 = smov 0  }
  0x33   :  { %v5187_v3 = vld [vmem:[#allocation7 + $0x10] sm:$0xff]  ;;  %v5189_v4 = vld [vmem:[#allocation7 + $0x18] sm:$0xff]  ;;  %v5191_v5 = vld [vmem:[#allocation7 + $0x20] sm:$0xff] }
  0x34   :  { %v5193_v6 = vld [vmem:[#allocation7 + $0x28] sm:$0xff]  ;;  %v5195_v7 = vld [vmem:[#allocation7 + $0x30] sm:$0xff]  ;;  %v5197_v8 = vld [vmem:[#allocation7 + $0x38] sm:$0xff] }
  0x35   :  { %v5199_v9 = vld [vmem:[#allocation7 + $0x40] sm:$0xff]  ;;  %v5201_v10 = vld [vmem:[#allocation7 + $0x48] sm:$0xff]  ;;  %v5203_v11 = vld [vmem:[#allocation7 + $0x50] sm:$0xff] }
  0x36   :  { %v5205_v12 = vld [vmem:[#allocation7 + $0x58] sm:$0xff]  ;;  %v5207_v13 = vld [vmem:[#allocation7 + $0x60] sm:$0xff]  ;;  %v5209_v14 = vld [vmem:[#allocation7 + $0x68] sm:$0xff] }
  0x37   :  { %v5211_v15 = vld [vmem:[#allocation7 + $0x70] sm:$0xff]  ;;  %v5213_v16 = vld [vmem:[#allocation7 + $0x78] sm:$0xff]  ;;  %v5215_v17 = vld [vmem:[#allocation8] sm:$0xff] }
  0x38 LB: > { %v5229_v18 = vpack.c.bf16 %v5185_v2, %v5183_v1  ;;  %v5112_v19 = vmov 0.0|0.0   ;;  %v5235_v20 = vpack.c.bf16 %v5189_v4, %v5187_v3  ;;  %vm5113_vm0 = vmmov 0   ;;  %s5317_s3 = sadd.s32 1, %s5105_s2   ;;  %s90_s26 = sld [smem:[#allocation3 + %s5105_s2]]  ;;  %s5105_s2 = sphi %s5219_s2, %s6023_s2   ;;  %v5101_v0 = vphi %v59_v0, %v2515_v0  }
  0x39   : > { %4214 = vmatprep.subr.bf16.mxu0 %v5112_v19  ;;  %4238 = vmatprep.subr.bf16.mxu1 %v5112_v19  ;;  %v5114_v21 = vmov 0.0   ;;  %v5248_v22 = vpack.c.bf16 %v5193_v6, %v5191_v5  ;;  %v5256_v23 = vpack.c.bf16 %v5197_v8, %v5195_v7  ;;  %v5264_v24 = vpack.c.bf16 %v5201_v10, %v5199_v9  ;;  %s89_s25 = sld [smem:[#allocation3 + %s5317_s3]]  ;;  %s2549_s6 = sshll.u32 %s5105_s2, 3 }
  0x3a   : > { %4216 = vmatpush3.bf16.msra.mxu0 %v5229_v18  ;;  %3126 = vmatprep.mubr.msk.f32.mxu0 %vm5113_vm0, %v5114_v21  ;;  %v5272_v25 = vpack.c.bf16 %v5205_v12, %v5203_v11  ;;  %v5280_v26 = vpack.c.bf16 %v5209_v14, %v5207_v13  ;;  %v5288_v27 = vpack.c.bf16 %v5213_v16, %v5211_v15  ;;  %s2517_s7 = scalar_lea.vmem [#allocation10], %s2549_s6  ;;  %p81_p5 = scmp.ge.s32.totalorder %s5317_s3, 8  }
  0x3b   : > { %4217 = vmatprep.subr.bf16.mxu0 %v5112_v19  ;;  %4240 = vmatpush3.bf16.msra.mxu1 %v5229_v18  ;;  %s6023_s2 = smov %s5317_s3  ;;  %s5115_s8 = smov (%p81_p5), [#allocation10]  }
  0x3c   : > { %3161 = vmatprep.mubr.msk.f32.mxu1 %vm5113_vm0, %v5114_v21  ;;  %4241 = vmatprep.subr.bf16.mxu1 %v5112_v19  ;;  %s2525_s10 = sshll.u32 (%p81_p5), %s5115_s8, 4  ;;  %s2526_s10 = int_to_ptr.vmem [resolvable:$true] %s2525_s10 }
  0x3d   :  { %s5061_s11 = scalar_lea.vmem (%p81_p5), %s2526_s10, 1024  ;;  %p5066_p7 = scmp.lt.s32.totalorder (%p81_p5), %s2526_s10, %s2526_s10 }
  0x3e   : > { %4219 = vmatpush3.bf16.msra.mxu0 %v5235_v20  ;;  %p5062_p6 = scmp.ne.s32.totalorder (%p81_p5), %s2526_s10, %s5061_s11  ;;  %p5067_p8 = scmp.lt.s32.totalorder (%p81_p5), %s5061_s11, %s5061_s11 }
  0x3f   : > { %4220 = vmatprep.subr.bf16.mxu0 %v5112_v19  ;;  %4243 = vmatpush3.bf16.msra.mxu1 %v5235_v20  ;;  %s91_s27 = ssub.f32 %s89_s25, %s90_s26 }
  0x40   : > { %4244 = vmatprep.subr.bf16.mxu1 %v5112_v19  ;;  %p5068_p9 = por (%p81_p5), %p5067_p8, %p5066_p7 }
  0x41   : > { %s5321_s28 = smul.f32 0.125, %s91_s27 }
  0x42   : > { %4222 = vmatpush3.bf16.msra.mxu0 %v5248_v22  ;;  %p5069_p10 = pnand (%p81_p5), %p5068_p9, %p5062_p6 }
  0x43   : > { %4223 = vmatprep.subr.bf16.mxu0 %v5112_v19  ;;  %4246 = vmatpush3.bf16.msra.mxu1 %v5248_v22  ;;  %s93_s29 = smul.f32 0.5, %s5321_s28  ;;  %v5380_v53 = vstv %s5321_s28 }
  0x44   : > { %4247 = vmatprep.subr.bf16.mxu1 %v5112_v19  ;;  %s94_s30 = smul.f32 0.16666667, %s5321_s28 }
  0x45   : > { %v5325_v32 = vstv %s93_s29  ;;  %s95_s5 = smul.f32 0.33333334, %s5321_s28 }
  0x46   : > { %4225 = vmatpush3.bf16.msra.mxu0 %v5256_v23  ;;  %v5349_v36 = vstv %s94_s30 }
  0x47   : > { %4226 = vmatprep.subr.bf16.mxu0 %v5112_v19  ;;  %4249 = vmatpush3.bf16.msra.mxu1 %v5256_v23  ;;  %v5354_v42 = vstv %s95_s5 }
  0x48   : > { %4250 = vmatprep.subr.bf16.mxu1 %v5112_v19 }
  0x4a   : > { %4228 = vmatpush3.bf16.msra.mxu0 %v5264_v24 }
  0x4b   : > { %4229 = vmatprep.subr.bf16.mxu0 %v5112_v19  ;;  %4252 = vmatpush3.bf16.msra.mxu1 %v5264_v24 }
  0x4c   : > { %4253 = vmatprep.subr.bf16.mxu1 %v5112_v19 }
  0x4e   : > { %4231 = vmatpush3.bf16.msra.mxu0 %v5272_v25 }
  0x4f   : > { %4232 = vmatprep.subr.bf16.mxu0 %v5112_v19  ;;  %4255 = vmatpush3.bf16.msra.mxu1 %v5272_v25 }
  0x50   : > { %4256 = vmatprep.subr.bf16.mxu1 %v5112_v19 }
  0x52   : > { %4234 = vmatpush3.bf16.msra.mxu0 %v5280_v26 }
  0x53   : > { %4235 = vmatprep.subr.bf16.mxu0 %v5112_v19  ;;  %4258 = vmatpush3.bf16.msra.mxu1 %v5280_v26 }
  0x54   : > { %4259 = vmatprep.subr.bf16.mxu1 %v5112_v19 }
  0x56   : > { %4237 = vmatpush3.bf16.msra.mxu0 %v5288_v27 }
  0x57   : > { %4262 = vmatprep.subr.bf16.mxu0 %v5112_v19  ;;  %4261 = vmatpush3.bf16.msra.mxu1 %v5288_v27 }
  0x58   : > { %4286 = vmatprep.subr.bf16.mxu1 %v5112_v19 }
  0x59   : > { %3127 = vmatmul.mubr.f32.vlgmr.msra.gmra.mrb[0].mxu0 %v5101_v0 }
  0x5a   : > { %4264 = vmatpush3.bf16.msra.mxu0 %v5229_v18  ;;  %3196 = vmatprep.mubr.msk.f32.mxu0 %vm5113_vm0, %v5114_v21 }
  0x5b   : > { %4265 = vmatprep.subr.bf16.mxu0 %v5112_v19 }
  0x5e   : > { %4267 = vmatpush3.bf16.msra.mxu0 %v5235_v20 }
  0x5f   : > { %4268 = vmatprep.subr.bf16.mxu0 %v5112_v19 }
  0x62   : > { %4270 = vmatpush3.bf16.msra.mxu0 %v5248_v22 }
  0x63   : > { %4271 = vmatprep.subr.bf16.mxu0 %v5112_v19 }
  0x66   : > { %4273 = vmatpush3.bf16.msra.mxu0 %v5256_v23 }
  0x67   : > { %4274 = vmatprep.subr.bf16.mxu0 %v5112_v19 }
  0x6a   : > { %4276 = vmatpush3.bf16.msra.mxu0 %v5264_v24 }
  0x6b   : > { %4277 = vmatprep.subr.bf16.mxu0 %v5112_v19 }
  0x6e   : > { %4279 = vmatpush3.bf16.msra.mxu0 %v5272_v25 }
  0x6f   : > { %4280 = vmatprep.subr.bf16.mxu0 %v5112_v19 }
  0x72   : > { %4282 = vmatpush3.bf16.msra.mxu0 %v5280_v26 }
  0x73   : > { %4283 = vmatprep.subr.bf16.mxu0 %v5112_v19 }
  0x76   : > { %4285 = vmatpush3.bf16.msra.mxu0 %v5288_v27 }
  0x77   : > { %4310 = vmatprep.subr.bf16.mxu0 %v5112_v19 }
 0x12c   : > { %v162_v28 = vpop.f32.mrb[0].mxu0 }
 0x12d   : > { %v163_v29 = vadd.f32 %v162_v28, %v5215_v17  ;;  %v3128_v30 = vpop.f32.mrb[1].mxu0 }
 0x12f   : > { %v166_v31 = vmax.f32 %v163_v29, 0.0 }
 0x131   : > { %v167_v33 = vsub.f32 %v166_v31, %v5101_v0 }
 0x133   : > { %v169_v34 = vmul.f32 %v5325_v32, %v167_v33  ;;  %v393_v40 = vmul.f32 %v5349_v36, %v167_v33 }
 0x135   : > { %v170_v35 = vadd.f32 %v5101_v0, %v169_v34  ;;  %v394_v44 = vadd.f32 %v5101_v0, %v393_v40 }
 0x137   : > { %3162 = vmatmul.mubr.f32.vlgmr.msra.gmra.mrb[0].mxu1 %v170_v35 }
 0x138   : > { %4288 = vmatpush3.bf16.msra.mxu1 %v5229_v18  ;;  %3231 = vmatprep.mubr.msk.f32.mxu1 %vm5113_vm0, %v5114_v21 }
 0x139   : > { %4289 = vmatprep.subr.bf16.mxu1 %v5112_v19 }
 0x13c   : > { %4291 = vmatpush3.bf16.msra.mxu1 %v5235_v20 }
 0x13d   : > { %4292 = vmatprep.subr.bf16.mxu1 %v5112_v19 }
 0x140   : > { %4294 = vmatpush3.bf16.msra.mxu1 %v5248_v22 }
 0x141   : > { %4295 = vmatprep.subr.bf16.mxu1 %v5112_v19 }
 0x144   : > { %4297 = vmatpush3.bf16.msra.mxu1 %v5256_v23 }
 0x145   : > { %4298 = vmatprep.subr.bf16.mxu1 %v5112_v19 }
 0x148   : > { %4300 = vmatpush3.bf16.msra.mxu1 %v5264_v24 }
 0x149   : > { %4301 = vmatprep.subr.bf16.mxu1 %v5112_v19 }
 0x14c   : > { %4303 = vmatpush3.bf16.msra.mxu1 %v5272_v25 }
 0x14d   : > { %4304 = vmatprep.subr.bf16.mxu1 %v5112_v19 }
 0x150   : > { %4306 = vmatpush3.bf16.msra.mxu1 %v5280_v26 }
 0x151   : > { %4307 = vmatprep.subr.bf16.mxu1 %v5112_v19 }
 0x154   : > { %4309 = vmatpush3.bf16.msra.mxu1 %v5288_v27 }
 0x155   : > { %4334 = vmatprep.subr.bf16.mxu1 %v5112_v19 }
 0x20a   : > { %v237_v37 = vpop.f32.mrb[0].mxu1 }
 0x20b   : > { %v238_v38 = vadd.f32 %v237_v37, %v5215_v17  ;;  %v3163_v39 = vpop.f32.mrb[1].mxu1 }
 0x20d   : > { %v241_v41 = vmax.f32 %v238_v38, 0.0 }
 0x20f   : > { %v242_v43 = vsub.f32 %v241_v41, %v170_v35 }
 0x211   : > { %v243_v45 = vmul.f32 %v242_v43, %v5325_v32  ;;  %v396_v46 = vmul.f32 %v5354_v42, %v242_v43 }
 0x213   : > { %v244_v47 = vadd.f32 %v5101_v0, %v243_v45  ;;  %v397_v48 = vadd.f32 %v396_v46, %v394_v44 }
 0x215   : > { %3197 = vmatmul.mubr.f32.vlgmr.msra.gmra.mrb[2].mxu0 %v244_v47 }
 0x216   : > { %4312 = vmatpush3.bf16.msra.mxu0 %v5229_v18  ;;  %3266 = vmatprep.mubr.msk.f32.mxu0 %vm5113_vm0, %v5114_v21 }
 0x217   : > { %4313 = vmatprep.subr.bf16.mxu0 %v5112_v19 }
 0x21a   : > { %4315 = vmatpush3.bf16.msra.mxu0 %v5235_v20 }
 0x21b   : > { %4316 = vmatprep.subr.bf16.mxu0 %v5112_v19 }
 0x21e   : > { %4318 = vmatpush3.bf16.msra.mxu0 %v5248_v22 }
 0x21f   : > { %4319 = vmatprep.subr.bf16.mxu0 %v5112_v19 }
 0x222   : > { %4321 = vmatpush3.bf16.msra.mxu0 %v5256_v23 }
 0x223   : > { %4322 = vmatprep.subr.bf16.mxu0 %v5112_v19 }
 0x226   : > { %4324 = vmatpush3.bf16.msra.mxu0 %v5264_v24 }
 0x227   : > { %4325 = vmatprep.subr.bf16.mxu0 %v5112_v19 }
 0x22a   : > { %4327 = vmatpush3.bf16.msra.mxu0 %v5272_v25 }
 0x22b   : > { %4328 = vmatprep.subr.bf16.mxu0 %v5112_v19 }
 0x22e   : > { %4330 = vmatpush3.bf16.msra.mxu0 %v5280_v26 }
 0x22f   : > { %4331 = vmatprep.subr.bf16.mxu0 %v5112_v19 }
 0x232   : > { %4333 = vmatpush3.bf16.msra.mxu0 %v5288_v27 }
 0x233   : > { %4358 = vmatprep.subr.bf16.mxu0 %v5112_v19 }
 0x2e8   : > { %v311_v49 = vpop.f32.mrb[2].mxu0 }
 0x2e9   : > { %v312_v50 = vadd.f32 %v311_v49, %v5215_v17  ;;  %v3198_v51 = vpop.f32.mrb[3].mxu0 }
 0x2eb   : > { %v315_v52 = vmax.f32 %v312_v50, 0.0 }
 0x2ed   : > { %v316_v54 = vsub.f32 %v315_v52, %v244_v47 }
 0x2ef   : > { %v318_v55 = vmul.f32 %v5380_v53, %v316_v54  ;;  %v398_v56 = vmul.f32 %v5354_v42, %v316_v54 }
 0x2f1   : > { %v319_v57 = vadd.f32 %v5101_v0, %v318_v55  ;;  %v399_v58 = vadd.f32 %v398_v56, %v397_v48 }
 0x2f3   : > { %3232 = vmatmul.mubr.f32.vlgmr.msra.gmra.mrb[2].mxu1 %v319_v57 }
 0x2f4   : > { %4336 = vmatpush3.bf16.msra.mxu1 %v5229_v18  ;;  %3301 = vmatprep.mubr.msk.f32.mxu1 %vm5113_vm0, %v5114_v21 }
 0x2f5   : > { %4337 = vmatprep.subr.bf16.mxu1 %v5112_v19 }
 0x2f8   : > { %4339 = vmatpush3.bf16.msra.mxu1 %v5235_v20 }
 0x2f9   : > { %4340 = vmatprep.subr.bf16.mxu1 %v5112_v19 }
 0x2fc   : > { %4342 = vmatpush3.bf16.msra.mxu1 %v5248_v22 }
 0x2fd   : > { %4343 = vmatprep.subr.bf16.mxu1 %v5112_v19 }
 0x300   : > { %4345 = vmatpush3.bf16.msra.mxu1 %v5256_v23 }
 0x301   : > { %4346 = vmatprep.subr.bf16.mxu1 %v5112_v19 }
 0x304   : > { %4348 = vmatpush3.bf16.msra.mxu1 %v5264_v24 }
 0x305   : > { %4349 = vmatprep.subr.bf16.mxu1 %v5112_v19 }
 0x308   : > { %4351 = vmatpush3.bf16.msra.mxu1 %v5272_v25 }
 0x309   : > { %4352 = vmatprep.subr.bf16.mxu1 %v5112_v19 }
 0x30c   : > { %4354 = vmatpush3.bf16.msra.mxu1 %v5280_v26 }
 0x30d   : > { %4355 = vmatprep.subr.bf16.mxu1 %v5112_v19 }
 0x310   : > { %4357 = vmatpush3.bf16.msra.mxu1 %v5288_v27 }
 0x311   : > { %4382 = vmatprep.subr.bf16.mxu1 %v5112_v19 }
 0x3c6   : > { %v386_v59 = vpop.f32.mrb[2].mxu1 }
 0x3c7   : > { %v387_v60 = vadd.f32 %v386_v59, %v5215_v17  ;;  %v3233_v61 = vpop.f32.mrb[3].mxu1 }
 0x3c9   : > { %v390_v62 = vmax.f32 %v387_v60, 0.0 }
 0x3cb   : > { %v391_v63 = vsub.f32 %v390_v62, %v319_v57 }
 0x3cd   : > { %v400_v0 = vmul.f32 %v5349_v36, %v391_v63 }
 0x3cf   : > { %v5405_v28 = vadd.f32 %v400_v0, %v399_v58 }
 0x3d1   : > { %3267 = vmatmul.mubr.f32.vlgmr.msra.gmra.mrb[4].mxu0 %v5405_v28 }
 0x3d2   : > { %4360 = vmatpush3.bf16.msra.mxu0 %v5229_v18  ;;  %3336 = vmatprep.mubr.msk.f32.mxu0 %vm5113_vm0, %v5114_v21 }
 0x3d3   : > { %4361 = vmatprep.subr.bf16.mxu0 %v5112_v19 }
 0x3d6   : > { %4363 = vmatpush3.bf16.msra.mxu0 %v5235_v20 }
 0x3d7   : > { %4364 = vmatprep.subr.bf16.mxu0 %v5112_v19 }
 0x3da   : > { %4366 = vmatpush3.bf16.msra.mxu0 %v5248_v22 }
 0x3db   : > { %4367 = vmatprep.subr.bf16.mxu0 %v5112_v19 }
 0x3de   : > { %4369 = vmatpush3.bf16.msra.mxu0 %v5256_v23 }
 0x3df   : > { %4370 = vmatprep.subr.bf16.mxu0 %v5112_v19 }
 0x3e2   : > { %4372 = vmatpush3.bf16.msra.mxu0 %v5264_v24 }
 0x3e3   : > { %4373 = vmatprep.subr.bf16.mxu0 %v5112_v19 }
 0x3e6   : > { %4375 = vmatpush3.bf16.msra.mxu0 %v5272_v25 }
 0x3e7   : > { %4376 = vmatprep.subr.bf16.mxu0 %v5112_v19 }
 0x3ea   : > { %4378 = vmatpush3.bf16.msra.mxu0 %v5280_v26 }
 0x3eb   : > { %4379 = vmatprep.subr.bf16.mxu0 %v5112_v19 }
 0x3ee   : > { %4381 = vmatpush3.bf16.msra.mxu0 %v5288_v27 }
 0x3ef   : > { %4406 = vmatprep.subr.bf16.mxu0 %v5112_v19 }
 0x4a4   : > { %v468_v29 = vpop.f32.mrb[4].mxu0 }
 0x4a5   : > { %v469_v30 = vadd.f32 %v468_v29, %v5215_v17  ;;  %v3268_v31 = vpop.f32.mrb[5].mxu0 }
 0x4a7   : > { %v472_v33 = vmax.f32 %v469_v30, 0.0 }
 0x4a9   : > { %v473_v34 = vsub.f32 %v472_v33, %v5405_v28 }
 0x4ab   : > { %v474_v35 = vmul.f32 %v473_v34, %v5325_v32  ;;  %v696_v41 = vmul.f32 %v473_v34, %v5349_v36 }
 0x4ad   : > { %v475_v37 = vadd.f32 %v474_v35, %v5405_v28  ;;  %v697_v45 = vadd.f32 %v696_v41, %v5405_v28 }
 0x4af   : > { %3302 = vmatmul.mubr.f32.vlgmr.msra.gmra.mrb[4].mxu1 %v475_v37 }
 0x4b0   : > { %4384 = vmatpush3.bf16.msra.mxu1 %v5229_v18  ;;  %3371 = vmatprep.mubr.msk.f32.mxu1 %vm5113_vm0, %v5114_v21 }
 0x4b1   : > { %4385 = vmatprep.subr.bf16.mxu1 %v5112_v19 }
 0x4b4   : > { %4387 = vmatpush3.bf16.msra.mxu1 %v5235_v20 }
 0x4b5   : > { %4388 = vmatprep.subr.bf16.mxu1 %v5112_v19 }
 0x4b8   : > { %4390 = vmatpush3.bf16.msra.mxu1 %v5248_v22 }
 0x4b9   : > { %4391 = vmatprep.subr.bf16.mxu1 %v5112_v19 }
 0x4bc   : > { %4393 = vmatpush3.bf16.msra.mxu1 %v5256_v23 }
 0x4bd   : > { %4394 = vmatprep.subr.bf16.mxu1 %v5112_v19 }
 0x4c0   : > { %4396 = vmatpush3.bf16.msra.mxu1 %v5264_v24 }
 0x4c1   : > { %4397 = vmatprep.subr.bf16.mxu1 %v5112_v19 }
 0x4c4   : > { %4399 = vmatpush3.bf16.msra.mxu1 %v5272_v25 }
 0x4c5   : > { %4400 = vmatprep.subr.bf16.mxu1 %v5112_v19 }
 0x4c8   : > { %4402 = vmatpush3.bf16.msra.mxu1 %v5280_v26 }
 0x4c9   : > { %4403 = vmatprep.subr.bf16.mxu1 %v5112_v19 }
 0x4cc   : > { %4405 = vmatpush3.bf16.msra.mxu1 %v5288_v27 }
 0x4cd   : > { %4430 = vmatprep.subr.bf16.mxu1 %v5112_v19 }
 0x582   : > { %v542_v38 = vpop.f32.mrb[4].mxu1 }
 0x583   : > { %v543_v39 = vadd.f32 %v542_v38, %v5215_v17  ;;  %v3303_v40 = vpop.f32.mrb[5].mxu1 }
 0x585   : > { %v546_v43 = vmax.f32 %v543_v39, 0.0 }
 0x587   : > { %v547_v44 = vsub.f32 %v546_v43, %v475_v37 }
 0x589   : > { %v548_v46 = vmul.f32 %v547_v44, %v5325_v32  ;;  %v698_v47 = vmul.f32 %v547_v44, %v5354_v42 }
 0x58b   : > { %v549_v48 = vadd.f32 %v548_v46, %v5405_v28  ;;  %v699_v49 = vadd.f32 %v698_v47, %v697_v45 }
 0x58d   : > { %3337 = vmatmul.mubr.f32.vlgmr.msra.gmra.mrb[6].mxu0 %v549_v48 }
 0x58e   : > { %4408 = vmatpush3.bf16.msra.mxu0 %v5229_v18  ;;  %3406 = vmatprep.mubr.msk.f32.mxu0 %vm5113_vm0, %v5114_v21 }
 0x58f   : > { %4409 = vmatprep.subr.bf16.mxu0 %v5112_v19 }
 0x592   : > { %4411 = vmatpush3.bf16.msra.mxu0 %v5235_v20 }
 0x593   : > { %4412 = vmatprep.subr.bf16.mxu0 %v5112_v19 }
 0x596   : > { %4414 = vmatpush3.bf16.msra.mxu0 %v5248_v22 }
 0x597   : > { %4415 = vmatprep.subr.bf16.mxu0 %v5112_v19 }
 0x59a   : > { %4417 = vmatpush3.bf16.msra.mxu0 %v5256_v23 }
 0x59b   : > { %4418 = vmatprep.subr.bf16.mxu0 %v5112_v19 }
 0x59e   : > { %4420 = vmatpush3.bf16.msra.mxu0 %v5264_v24 }
 0x59f   : > { %4421 = vmatprep.subr.bf16.mxu0 %v5112_v19 }
 0x5a2   : > { %4423 = vmatpush3.bf16.msra.mxu0 %v5272_v25 }
 0x5a3   : > { %4424 = vmatprep.subr.bf16.mxu0 %v5112_v19 }
 0x5a6   : > { %4426 = vmatpush3.bf16.msra.mxu0 %v5280_v26 }
 0x5a7   : > { %4427 = vmatprep.subr.bf16.mxu0 %v5112_v19 }
 0x5aa   : > { %4429 = vmatpush3.bf16.msra.mxu0 %v5288_v27 }
 0x5ab   : > { %4454 = vmatprep.subr.bf16.mxu0 %v5112_v19 }
 0x660   : > { %v616_v50 = vpop.f32.mrb[6].mxu0 }
 0x661   : > { %v617_v51 = vadd.f32 %v616_v50, %v5215_v17  ;;  %v3338_v52 = vpop.f32.mrb[7].mxu0 }
 0x663   : > { %v620_v54 = vmax.f32 %v617_v51, 0.0 }
 0x665   : > { %v621_v55 = vsub.f32 %v620_v54, %v549_v48 }
 0x667   : > { %v622_v56 = vmul.f32 %v621_v55, %v5380_v53  ;;  %v700_v57 = vmul.f32 %v621_v55, %v5354_v42 }
 0x669   : > { %v623_v58 = vadd.f32 %v622_v56, %v5405_v28  ;;  %v701_v59 = vadd.f32 %v700_v57, %v699_v49 }
 0x66b   : > { %3372 = vmatmul.mubr.f32.vlgmr.msra.gmra.mrb[6].mxu1 %v623_v58 }
 0x66c   : > { %4432 = vmatpush3.bf16.msra.mxu1 %v5229_v18  ;;  %3441 = vmatprep.mubr.msk.f32.mxu1 %vm5113_vm0, %v5114_v21 }
 0x66d   : > { %4433 = vmatprep.subr.bf16.mxu1 %v5112_v19 }
 0x670   : > { %4435 = vmatpush3.bf16.msra.mxu1 %v5235_v20 }
 0x671   : > { %4436 = vmatprep.subr.bf16.mxu1 %v5112_v19 }
 0x674   : > { %4438 = vmatpush3.bf16.msra.mxu1 %v5248_v22 }
 0x675   : > { %4439 = vmatprep.subr.bf16.mxu1 %v5112_v19 }
 0x678   : > { %4441 = vmatpush3.bf16.msra.mxu1 %v5256_v23 }
 0x679   : > { %4442 = vmatprep.subr.bf16.mxu1 %v5112_v19 }
 0x67c   : > { %4444 = vmatpush3.bf16.msra.mxu1 %v5264_v24 }
 0x67d   : > { %4445 = vmatprep.subr.bf16.mxu1 %v5112_v19 }
 0x680   : > { %4447 = vmatpush3.bf16.msra.mxu1 %v5272_v25 }
 0x681   : > { %4448 = vmatprep.subr.bf16.mxu1 %v5112_v19 }
 0x684   : > { %4450 = vmatpush3.bf16.msra.mxu1 %v5280_v26 }
 0x685   : > { %4451 = vmatprep.subr.bf16.mxu1 %v5112_v19 }
 0x688   : > { %4453 = vmatpush3.bf16.msra.mxu1 %v5288_v27 }
 0x689   : > { %4478 = vmatprep.subr.bf16.mxu1 %v5112_v19 }
 0x73e   : > { %v690_v60 = vpop.f32.mrb[6].mxu1 }
 0x73f   : > { %v691_v61 = vadd.f32 %v690_v60, %v5215_v17  ;;  %v3373_v62 = vpop.f32.mrb[7].mxu1 }
 0x741   : > { %v694_v63 = vmax.f32 %v691_v61, 0.0 }
 0x743   : > { %v695_v0 = vsub.f32 %v694_v63, %v623_v58 }
 0x745   : > { %v702_v28 = vmul.f32 %v695_v0, %v5349_v36 }
 0x747   : > { %v5496_v29 = vadd.f32 %v702_v28, %v701_v59 }
 0x749   : > { %3407 = vmatmul.mubr.f32.vlgmr.msra.gmra.mrb[8].mxu0 %v5496_v29 }
 0x74a   : > { %4456 = vmatpush3.bf16.msra.mxu0 %v5229_v18  ;;  %3476 = vmatprep.mubr.msk.f32.mxu0 %vm5113_vm0, %v5114_v21 }
 0x74b   : > { %4457 = vmatprep.subr.bf16.mxu0 %v5112_v19 }
 0x74e   : > { %4459 = vmatpush3.bf16.msra.mxu0 %v5235_v20 }
 0x74f   : > { %4460 = vmatprep.subr.bf16.mxu0 %v5112_v19 }
 0x752   : > { %4462 = vmatpush3.bf16.msra.mxu0 %v5248_v22 }
 0x753   : > { %4463 = vmatprep.subr.bf16.mxu0 %v5112_v19 }
 0x756   : > { %4465 = vmatpush3.bf16.msra.mxu0 %v5256_v23 }
 0x757   : > { %4466 = vmatprep.subr.bf16.mxu0 %v5112_v19 }
 0x75a   : > { %4468 = vmatpush3.bf16.msra.mxu0 %v5264_v24 }
 0x75b   : > { %4469 = vmatprep.subr.bf16.mxu0 %v5112_v19 }
 0x75e   : > { %4471 = vmatpush3.bf16.msra.mxu0 %v5272_v25 }
 0x75f   : > { %4472 = vmatprep.subr.bf16.mxu0 %v5112_v19 }
 0x762   : > { %4474 = vmatpush3.bf16.msra.mxu0 %v5280_v26 }
 0x763   : > { %4475 = vmatprep.subr.bf16.mxu0 %v5112_v19 }
 0x766   : > { %4477 = vmatpush3.bf16.msra.mxu0 %v5288_v27 }
 0x767   : > { %4502 = vmatprep.subr.bf16.mxu0 %v5112_v19 }
 0x81c   : > { %v770_v30 = vpop.f32.mrb[8].mxu0 }
 0x81d   : > { %v771_v31 = vadd.f32 %v770_v30, %v5215_v17  ;;  %v3408_v33 = vpop.f32.mrb[9].mxu0 }
 0x81f   : > { %v774_v34 = vmax.f32 %v771_v31, 0.0 }
 0x821   : > { %v775_v35 = vsub.f32 %v774_v34, %v5496_v29 }
 0x823   : > { %v776_v37 = vmul.f32 %v775_v35, %v5325_v32  ;;  %v998_v43 = vmul.f32 %v775_v35, %v5349_v36 }
 0x825   : > { %v777_v38 = vadd.f32 %v776_v37, %v5496_v29  ;;  %v999_v46 = vadd.f32 %v998_v43, %v5496_v29 }
 0x827   : > { %3442 = vmatmul.mubr.f32.vlgmr.msra.gmra.mrb[8].mxu1 %v777_v38 }
 0x828   : > { %4480 = vmatpush3.bf16.msra.mxu1 %v5229_v18  ;;  %3511 = vmatprep.mubr.msk.f32.mxu1 %vm5113_vm0, %v5114_v21 }
 0x829   : > { %4481 = vmatprep.subr.bf16.mxu1 %v5112_v19 }
 0x82c   : > { %4483 = vmatpush3.bf16.msra.mxu1 %v5235_v20 }
 0x82d   : > { %4484 = vmatprep.subr.bf16.mxu1 %v5112_v19 }
 0x830   : > { %4486 = vmatpush3.bf16.msra.mxu1 %v5248_v22 }
 0x831   : > { %4487 = vmatprep.subr.bf16.mxu1 %v5112_v19 }
 0x834   : > { %4489 = vmatpush3.bf16.msra.mxu1 %v5256_v23 }
 0x835   : > { %4490 = vmatprep.subr.bf16.mxu1 %v5112_v19 }
 0x838   : > { %4492 = vmatpush3.bf16.msra.mxu1 %v5264_v24 }
 0x839   : > { %4493 = vmatprep.subr.bf16.mxu1 %v5112_v19 }
 0x83c   : > { %4495 = vmatpush3.bf16.msra.mxu1 %v5272_v25 }
 0x83d   : > { %4496 = vmatprep.subr.bf16.mxu1 %v5112_v19 }
 0x840   : > { %4498 = vmatpush3.bf16.msra.mxu1 %v5280_v26 }
 0x841   : > { %4499 = vmatprep.subr.bf16.mxu1 %v5112_v19 }
 0x844   : > { %4501 = vmatpush3.bf16.msra.mxu1 %v5288_v27 }
 0x845   : > { %4526 = vmatprep.subr.bf16.mxu1 %v5112_v19 }
 0x8fa   : > { %v844_v39 = vpop.f32.mrb[8].mxu1 }
 0x8fb   : > { %v845_v40 = vadd.f32 %v844_v39, %v5215_v17  ;;  %v3443_v41 = vpop.f32.mrb[9].mxu1 }
 0x8fd   : > { %v848_v44 = vmax.f32 %v845_v40, 0.0 }
 0x8ff   : > { %v849_v45 = vsub.f32 %v848_v44, %v777_v38 }
 0x901   : > { %v850_v47 = vmul.f32 %v849_v45, %v5325_v32  ;;  %v1000_v48 = vmul.f32 %v849_v45, %v5354_v42 }
 0x903   : > { %v851_v49 = vadd.f32 %v850_v47, %v5496_v29  ;;  %v1001_v50 = vadd.f32 %v1000_v48, %v999_v46 }
 0x905   : > { %3477 = vmatmul.mubr.f32.vlgmr.msra.gmra.mrb[10].mxu0 %v851_v49 }
 0x906   : > { %4504 = vmatpush3.bf16.msra.mxu0 %v5229_v18  ;;  %3546 = vmatprep.mubr.msk.f32.mxu0 %vm5113_vm0, %v5114_v21 }
 0x907   : > { %4505 = vmatprep.subr.bf16.mxu0 %v5112_v19 }
 0x90a   : > { %4507 = vmatpush3.bf16.msra.mxu0 %v5235_v20 }
 0x90b   : > { %4508 = vmatprep.subr.bf16.mxu0 %v5112_v19 }
 0x90e   : > { %4510 = vmatpush3.bf16.msra.mxu0 %v5248_v22 }
 0x90f   : > { %4511 = vmatprep.subr.bf16.mxu0 %v5112_v19 }
 0x912   : > { %4513 = vmatpush3.bf16.msra.mxu0 %v5256_v23 }
 0x913   : > { %4514 = vmatprep.subr.bf16.mxu0 %v5112_v19 }
 0x916   : > { %4516 = vmatpush3.bf16.msra.mxu0 %v5264_v24 }
 0x917   : > { %4517 = vmatprep.subr.bf16.mxu0 %v5112_v19 }
 0x91a   : > { %4519 = vmatpush3.bf16.msra.mxu0 %v5272_v25 }
 0x91b   : > { %4520 = vmatprep.subr.bf16.mxu0 %v5112_v19 }
 0x91e   : > { %4522 = vmatpush3.bf16.msra.mxu0 %v5280_v26 }
 0x91f   : > { %4523 = vmatprep.subr.bf16.mxu0 %v5112_v19 }
 0x922   : > { %4525 = vmatpush3.bf16.msra.mxu0 %v5288_v27 }
 0x923   : > { %4550 = vmatprep.subr.bf16.mxu0 %v5112_v19 }
 0x9d8   : > { %v918_v51 = vpop.f32.mrb[10].mxu0 }
 0x9d9   : > { %v919_v52 = vadd.f32 %v918_v51, %v5215_v17  ;;  %v3478_v54 = vpop.f32.mrb[11].mxu0 }
 0x9db   : > { %v922_v55 = vmax.f32 %v919_v52, 0.0 }
 0x9dd   : > { %v923_v56 = vsub.f32 %v922_v55, %v851_v49 }
 0x9df   : > { %v924_v57 = vmul.f32 %v923_v56, %v5380_v53  ;;  %v1002_v58 = vmul.f32 %v923_v56, %v5354_v42 }
 0x9e1   : > { %v925_v59 = vadd.f32 %v924_v57, %v5496_v29  ;;  %v1003_v60 = vadd.f32 %v1002_v58, %v1001_v50 }
 0x9e3   : > { %3512 = vmatmul.mubr.f32.vlgmr.msra.gmra.mrb[10].mxu1 %v925_v59 }
 0x9e4   : > { %4528 = vmatpush3.bf16.msra.mxu1 %v5229_v18  ;;  %3581 = vmatprep.mubr.msk.f32.mxu1 %vm5113_vm0, %v5114_v21 }
 0x9e5   : > { %4529 = vmatprep.subr.bf16.mxu1 %v5112_v19 }
 0x9e8   : > { %4531 = vmatpush3.bf16.msra.mxu1 %v5235_v20 }
 0x9e9   : > { %4532 = vmatprep.subr.bf16.mxu1 %v5112_v19 }
 0x9ec   : > { %4534 = vmatpush3.bf16.msra.mxu1 %v5248_v22 }
 0x9ed   : > { %4535 = vmatprep.subr.bf16.mxu1 %v5112_v19 }
 0x9f0   : > { %4537 = vmatpush3.bf16.msra.mxu1 %v5256_v23 }
 0x9f1   : > { %4538 = vmatprep.subr.bf16.mxu1 %v5112_v19 }
 0x9f4   : > { %4540 = vmatpush3.bf16.msra.mxu1 %v5264_v24 }
 0x9f5   : > { %4541 = vmatprep.subr.bf16.mxu1 %v5112_v19 }
 0x9f8   : > { %4543 = vmatpush3.bf16.msra.mxu1 %v5272_v25 }
 0x9f9   : > { %4544 = vmatprep.subr.bf16.mxu1 %v5112_v19 }
 0x9fc   : > { %4546 = vmatpush3.bf16.msra.mxu1 %v5280_v26 }
 0x9fd   : > { %4547 = vmatprep.subr.bf16.mxu1 %v5112_v19 }
 0xa00   : > { %4549 = vmatpush3.bf16.msra.mxu1 %v5288_v27 }
 0xa01   : > { %4574 = vmatprep.subr.bf16.mxu1 %v5112_v19 }
 0xab6   : > { %v992_v61 = vpop.f32.mrb[10].mxu1 }
 0xab7   : > { %v993_v62 = vadd.f32 %v992_v61, %v5215_v17  ;;  %v3513_v63 = vpop.f32.mrb[11].mxu1 }
 0xab9   : > { %v996_v0 = vmax.f32 %v993_v62, 0.0 }
 0xabb   : > { %v997_v28 = vsub.f32 %v996_v0, %v925_v59 }
 0xabd   : > { %v1004_v29 = vmul.f32 %v997_v28, %v5349_v36 }
 0xabf   : > { %v5587_v30 = vadd.f32 %v1004_v29, %v1003_v60 }
 0xac1   : > { %3547 = vmatmul.mubr.f32.vlgmr.msra.gmra.mrb[12].mxu0 %v5587_v30 }
 0xac2   : > { %4552 = vmatpush3.bf16.msra.mxu0 %v5229_v18  ;;  %3616 = vmatprep.mubr.msk.f32.mxu0 %vm5113_vm0, %v5114_v21 }
 0xac3   : > { %4553 = vmatprep.subr.bf16.mxu0 %v5112_v19 }
 0xac6   : > { %4555 = vmatpush3.bf16.msra.mxu0 %v5235_v20 }
 0xac7   : > { %4556 = vmatprep.subr.bf16.mxu0 %v5112_v19 }
 0xaca   : > { %4558 = vmatpush3.bf16.msra.mxu0 %v5248_v22 }
 0xacb   : > { %4559 = vmatprep.subr.bf16.mxu0 %v5112_v19 }
 0xace   : > { %4561 = vmatpush3.bf16.msra.mxu0 %v5256_v23 }
 0xacf   : > { %4562 = vmatprep.subr.bf16.mxu0 %v5112_v19 }
 0xad2   : > { %4564 = vmatpush3.bf16.msra.mxu0 %v5264_v24 }
 0xad3   : > { %4565 = vmatprep.subr.bf16.mxu0 %v5112_v19 }
 0xad6   : > { %4567 = vmatpush3.bf16.msra.mxu0 %v5272_v25 }
 0xad7   : > { %4568 = vmatprep.subr.bf16.mxu0 %v5112_v19 }
 0xada   : > { %4570 = vmatpush3.bf16.msra.mxu0 %v5280_v26 }
 0xadb   : > { %4571 = vmatprep.subr.bf16.mxu0 %v5112_v19 }
 0xade   : > { %4573 = vmatpush3.bf16.msra.mxu0 %v5288_v27 }
 0xadf   : > { %4598 = vmatprep.subr.bf16.mxu0 %v5112_v19 }
 0xb94   : > { %v1072_v31 = vpop.f32.mrb[12].mxu0 }
 0xb95   : > { %v1073_v33 = vadd.f32 %v1072_v31, %v5215_v17  ;;  %v3548_v34 = vpop.f32.mrb[13].mxu0 }
 0xb97   : > { %v1076_v35 = vmax.f32 %v1073_v33, 0.0 }
 0xb99   : > { %v1077_v37 = vsub.f32 %v1076_v35, %v5587_v30 }
 0xb9b   : > { %v1078_v38 = vmul.f32 %v1077_v37, %v5325_v32  ;;  %v1300_v44 = vmul.f32 %v1077_v37, %v5349_v36 }
 0xb9d   : > { %v1079_v39 = vadd.f32 %v1078_v38, %v5587_v30  ;;  %v1301_v47 = vadd.f32 %v1300_v44, %v5587_v30 }
 0xb9f   : > { %3582 = vmatmul.mubr.f32.vlgmr.msra.gmra.mrb[12].mxu1 %v1079_v39 }
 0xba0   : > { %4576 = vmatpush3.bf16.msra.mxu1 %v5229_v18  ;;  %3651 = vmatprep.mubr.msk.f32.mxu1 %vm5113_vm0, %v5114_v21 }
 0xba1   : > { %4577 = vmatprep.subr.bf16.mxu1 %v5112_v19 }
 0xba4   : > { %4579 = vmatpush3.bf16.msra.mxu1 %v5235_v20 }
 0xba5   : > { %4580 = vmatprep.subr.bf16.mxu1 %v5112_v19 }
 0xba8   : > { %4582 = vmatpush3.bf16.msra.mxu1 %v5248_v22 }
 0xba9   : > { %4583 = vmatprep.subr.bf16.mxu1 %v5112_v19 }
 0xbac   : > { %4585 = vmatpush3.bf16.msra.mxu1 %v5256_v23 }
 0xbad   : > { %4586 = vmatprep.subr.bf16.mxu1 %v5112_v19 }
 0xbb0   : > { %4588 = vmatpush3.bf16.msra.mxu1 %v5264_v24 }
 0xbb1   : > { %4589 = vmatprep.subr.bf16.mxu1 %v5112_v19 }
 0xbb4   : > { %4591 = vmatpush3.bf16.msra.mxu1 %v5272_v25 }
 0xbb5   : > { %4592 = vmatprep.subr.bf16.mxu1 %v5112_v19 }
 0xbb8   : > { %4594 = vmatpush3.bf16.msra.mxu1 %v5280_v26 }
 0xbb9   : > { %4595 = vmatprep.subr.bf16.mxu1 %v5112_v19 }
 0xbbc   : > { %4597 = vmatpush3.bf16.msra.mxu1 %v5288_v27 }
 0xbbd   : > { %4622 = vmatprep.subr.bf16.mxu1 %v5112_v19 }
 0xc72   : > { %v1146_v40 = vpop.f32.mrb[12].mxu1 }
 0xc73   : > { %v1147_v41 = vadd.f32 %v1146_v40, %v5215_v17  ;;  %v3583_v43 = vpop.f32.mrb[13].mxu1 }
 0xc75   : > { %v1150_v45 = vmax.f32 %v1147_v41, 0.0 }
 0xc77   : > { %v1151_v46 = vsub.f32 %v1150_v45, %v1079_v39 }
 0xc79   : > { %v1152_v48 = vmul.f32 %v1151_v46, %v5325_v32  ;;  %v1302_v49 = vmul.f32 %v1151_v46, %v5354_v42 }
 0xc7b   : > { %v1153_v50 = vadd.f32 %v1152_v48, %v5587_v30  ;;  %v1303_v51 = vadd.f32 %v1302_v49, %v1301_v47 }
 0xc7d   : > { %3617 = vmatmul.mubr.f32.vlgmr.msra.gmra.mrb[14].mxu0 %v1153_v50 }
 0xc7e   : > { %4600 = vmatpush3.bf16.msra.mxu0 %v5229_v18  ;;  %3686 = vmatprep.mubr.msk.f32.mxu0 %vm5113_vm0, %v5114_v21 }
 0xc7f   : > { %4601 = vmatprep.subr.bf16.mxu0 %v5112_v19 }
 0xc82   : > { %4603 = vmatpush3.bf16.msra.mxu0 %v5235_v20 }
 0xc83   : > { %4604 = vmatprep.subr.bf16.mxu0 %v5112_v19 }
 0xc86   : > { %4606 = vmatpush3.bf16.msra.mxu0 %v5248_v22 }
 0xc87   : > { %4607 = vmatprep.subr.bf16.mxu0 %v5112_v19 }
 0xc8a   : > { %4609 = vmatpush3.bf16.msra.mxu0 %v5256_v23 }
 0xc8b   : > { %4610 = vmatprep.subr.bf16.mxu0 %v5112_v19 }
 0xc8e   : > { %4612 = vmatpush3.bf16.msra.mxu0 %v5264_v24 }
 0xc8f   : > { %4613 = vmatprep.subr.bf16.mxu0 %v5112_v19 }
 0xc92   : > { %4615 = vmatpush3.bf16.msra.mxu0 %v5272_v25 }
 0xc93   : > { %4616 = vmatprep.subr.bf16.mxu0 %v5112_v19 }
 0xc96   : > { %4618 = vmatpush3.bf16.msra.mxu0 %v5280_v26 }
 0xc97   : > { %4619 = vmatprep.subr.bf16.mxu0 %v5112_v19 }
 0xc9a   : > { %4621 = vmatpush3.bf16.msra.mxu0 %v5288_v27 }
 0xc9b   : > { %4646 = vmatprep.subr.bf16.mxu0 %v5112_v19 }
 0xd50   : > { %v1220_v52 = vpop.f32.mrb[14].mxu0 }
 0xd51   : > { %v1221_v54 = vadd.f32 %v1220_v52, %v5215_v17  ;;  %v3618_v55 = vpop.f32.mrb[15].mxu0 }
 0xd53   : > { %v1224_v56 = vmax.f32 %v1221_v54, 0.0 }
 0xd55   : > { %v1225_v57 = vsub.f32 %v1224_v56, %v1153_v50 }
 0xd57   : > { %v1226_v58 = vmul.f32 %v1225_v57, %v5380_v53  ;;  %v1304_v59 = vmul.f32 %v1225_v57, %v5354_v42 }
 0xd59   : > { %v1227_v60 = vadd.f32 %v1226_v58, %v5587_v30  ;;  %v1305_v61 = vadd.f32 %v1304_v59, %v1303_v51 }
 0xd5b   : > { %3652 = vmatmul.mubr.f32.vlgmr.msra.gmra.mrb[14].mxu1 %v1227_v60 }
 0xd5c   : > { %4624 = vmatpush3.bf16.msra.mxu1 %v5229_v18  ;;  %3721 = vmatprep.mubr.msk.f32.mxu1 %vm5113_vm0, %v5114_v21 }
 0xd5d   : > { %4625 = vmatprep.subr.bf16.mxu1 %v5112_v19 }
 0xd60   : > { %4627 = vmatpush3.bf16.msra.mxu1 %v5235_v20 }
 0xd61   : > { %4628 = vmatprep.subr.bf16.mxu1 %v5112_v19 }
 0xd64   : > { %4630 = vmatpush3.bf16.msra.mxu1 %v5248_v22 }
 0xd65   : > { %4631 = vmatprep.subr.bf16.mxu1 %v5112_v19 }
 0xd68   : > { %4633 = vmatpush3.bf16.msra.mxu1 %v5256_v23 }
 0xd69   : > { %4634 = vmatprep.subr.bf16.mxu1 %v5112_v19 }
 0xd6c   : > { %4636 = vmatpush3.bf16.msra.mxu1 %v5264_v24 }
 0xd6d   : > { %4637 = vmatprep.subr.bf16.mxu1 %v5112_v19 }
 0xd70   : > { %4639 = vmatpush3.bf16.msra.mxu1 %v5272_v25 }
 0xd71   : > { %4640 = vmatprep.subr.bf16.mxu1 %v5112_v19 }
 0xd74   : > { %4642 = vmatpush3.bf16.msra.mxu1 %v5280_v26 }
 0xd75   : > { %4643 = vmatprep.subr.bf16.mxu1 %v5112_v19 }
 0xd78   : > { %4645 = vmatpush3.bf16.msra.mxu1 %v5288_v27 }
 0xd79   : > { %4670 = vmatprep.subr.bf16.mxu1 %v5112_v19 }
 0xe2e   : > { %v1294_v62 = vpop.f32.mrb[14].mxu1 }
 0xe2f   : > { %v1295_v63 = vadd.f32 %v1294_v62, %v5215_v17  ;;  %v3653_v0 = vpop.f32.mrb[15].mxu1 }
 0xe31   : > { %v1298_v28 = vmax.f32 %v1295_v63, 0.0 }
 0xe33   : > { %v1299_v29 = vsub.f32 %v1298_v28, %v1227_v60 }
 0xe35   : > { %v1306_v30 = vmul.f32 %v1299_v29, %v5349_v36 }
 0xe37   : > { %v5678_v31 = vadd.f32 %v1306_v30, %v1305_v61 }
 0xe39   : > { %3687 = vmatmul.mubr.f32.vlgmr.msra.gmra.mrb[16].mxu0 %v5678_v31 }
 0xe3a   : > { %4648 = vmatpush3.bf16.msra.mxu0 %v5229_v18  ;;  %3756 = vmatprep.mubr.msk.f32.mxu0 %vm5113_vm0, %v5114_v21 }
 0xe3b   : > { %4649 = vmatprep.subr.bf16.mxu0 %v5112_v19 }
 0xe3e   : > { %4651 = vmatpush3.bf16.msra.mxu0 %v5235_v20 }
 0xe3f   : > { %4652 = vmatprep.subr.bf16.mxu0 %v5112_v19 }
 0xe42   : > { %4654 = vmatpush3.bf16.msra.mxu0 %v5248_v22 }
 0xe43   : > { %4655 = vmatprep.subr.bf16.mxu0 %v5112_v19 }
 0xe46   : > { %4657 = vmatpush3.bf16.msra.mxu0 %v5256_v23 }
 0xe47   : > { %4658 = vmatprep.subr.bf16.mxu0 %v5112_v19 }
 0xe4a   : > { %4660 = vmatpush3.bf16.msra.mxu0 %v5264_v24 }
 0xe4b   : > { %4661 = vmatprep.subr.bf16.mxu0 %v5112_v19 }
 0xe4e   : > { %4663 = vmatpush3.bf16.msra.mxu0 %v5272_v25 }
 0xe4f   : > { %4664 = vmatprep.subr.bf16.mxu0 %v5112_v19 }
 0xe52   : > { %4666 = vmatpush3.bf16.msra.mxu0 %v5280_v26 }
 0xe53   : > { %4667 = vmatprep.subr.bf16.mxu0 %v5112_v19 }
 0xe56   : > { %4669 = vmatpush3.bf16.msra.mxu0 %v5288_v27 }
 0xe57   : > { %4694 = vmatprep.subr.bf16.mxu0 %v5112_v19 }
 0xf0c   : > { %v1374_v33 = vpop.f32.mrb[16].mxu0 }
 0xf0d   : > { %v1375_v34 = vadd.f32 %v1374_v33, %v5215_v17  ;;  %v3688_v35 = vpop.f32.mrb[17].mxu0 }
 0xf0f   : > { %v1378_v37 = vmax.f32 %v1375_v34, 0.0 }
 0xf11   : > { %v1379_v38 = vsub.f32 %v1378_v37, %v5678_v31 }
 0xf13   : > { %v1380_v39 = vmul.f32 %v1379_v38, %v5325_v32  ;;  %v1602_v45 = vmul.f32 %v1379_v38, %v5349_v36 }
 0xf15   : > { %v1381_v40 = vadd.f32 %v1380_v39, %v5678_v31  ;;  %v1603_v48 = vadd.f32 %v1602_v45, %v5678_v31 }
 0xf17   : > { %3722 = vmatmul.mubr.f32.vlgmr.msra.gmra.mrb[16].mxu1 %v1381_v40 }
 0xf18   : > { %4672 = vmatpush3.bf16.msra.mxu1 %v5229_v18  ;;  %3791 = vmatprep.mubr.msk.f32.mxu1 %vm5113_vm0, %v5114_v21 }
 0xf19   : > { %4673 = vmatprep.subr.bf16.mxu1 %v5112_v19 }
 0xf1c   : > { %4675 = vmatpush3.bf16.msra.mxu1 %v5235_v20 }
 0xf1d   : > { %4676 = vmatprep.subr.bf16.mxu1 %v5112_v19 }
 0xf20   : > { %4678 = vmatpush3.bf16.msra.mxu1 %v5248_v22 }
 0xf21   : > { %4679 = vmatprep.subr.bf16.mxu1 %v5112_v19 }
 0xf24   : > { %4681 = vmatpush3.bf16.msra.mxu1 %v5256_v23 }
 0xf25   : > { %4682 = vmatprep.subr.bf16.mxu1 %v5112_v19 }
 0xf28   : > { %4684 = vmatpush3.bf16.msra.mxu1 %v5264_v24 }
 0xf29   : > { %4685 = vmatprep.subr.bf16.mxu1 %v5112_v19 }
 0xf2c   : > { %4687 = vmatpush3.bf16.msra.mxu1 %v5272_v25 }
 0xf2d   : > { %4688 = vmatprep.subr.bf16.mxu1 %v5112_v19 }
 0xf30   : > { %4690 = vmatpush3.bf16.msra.mxu1 %v5280_v26 }
 0xf31   : > { %4691 = vmatprep.subr.bf16.mxu1 %v5112_v19 }
 0xf34   : > { %4693 = vmatpush3.bf16.msra.mxu1 %v5288_v27 }
 0xf35   : > { %4718 = vmatprep.subr.bf16.mxu1 %v5112_v19 }
 0xfea   : > { %v1448_v41 = vpop.f32.mrb[16].mxu1 }
 0xfeb   : > { %v1449_v43 = vadd.f32 %v1448_v41, %v5215_v17  ;;  %v3723_v44 = vpop.f32.mrb[17].mxu1 }
 0xfed   : > { %v1452_v46 = vmax.f32 %v1449_v43, 0.0 }
 0xfef   : > { %v1453_v47 = vsub.f32 %v1452_v46, %v1381_v40 }
 0xff1   : > { %v1454_v49 = vmul.f32 %v1453_v47, %v5325_v32  ;;  %v1604_v50 = vmul.f32 %v1453_v47, %v5354_v42 }
 0xff3   : > { %v1455_v51 = vadd.f32 %v1454_v49, %v5678_v31  ;;  %v1605_v52 = vadd.f32 %v1604_v50, %v1603_v48 }
 0xff5   : > { %3757 = vmatmul.mubr.f32.vlgmr.msra.gmra.mrb[18].mxu0 %v1455_v51 }
 0xff6   : > { %4696 = vmatpush3.bf16.msra.mxu0 %v5229_v18  ;;  %3826 = vmatprep.mubr.msk.f32.mxu0 %vm5113_vm0, %v5114_v21 }
 0xff7   : > { %4697 = vmatprep.subr.bf16.mxu0 %v5112_v19 }
 0xffa   : > { %4699 = vmatpush3.bf16.msra.mxu0 %v5235_v20 }
 0xffb   : > { %4700 = vmatprep.subr.bf16.mxu0 %v5112_v19 }
 0xffe   : > { %4702 = vmatpush3.bf16.msra.mxu0 %v5248_v22 }
 0xfff   : > { %4703 = vmatprep.subr.bf16.mxu0 %v5112_v19 }
0x1002   : > { %4705 = vmatpush3.bf16.msra.mxu0 %v5256_v23 }
0x1003   : > { %4706 = vmatprep.subr.bf16.mxu0 %v5112_v19 }
0x1006   : > { %4708 = vmatpush3.bf16.msra.mxu0 %v5264_v24 }
0x1007   : > { %4709 = vmatprep.subr.bf16.mxu0 %v5112_v19 }
0x100a   : > { %4711 = vmatpush3.bf16.msra.mxu0 %v5272_v25 }
0x100b   : > { %4712 = vmatprep.subr.bf16.mxu0 %v5112_v19 }
0x100e   : > { %4714 = vmatpush3.bf16.msra.mxu0 %v5280_v26 }
0x100f   : > { %4715 = vmatprep.subr.bf16.mxu0 %v5112_v19 }
0x1012   : > { %4717 = vmatpush3.bf16.msra.mxu0 %v5288_v27 }
0x1013   : > { %4742 = vmatprep.subr.bf16.mxu0 %v5112_v19 }
0x10c8   : > { %v1522_v54 = vpop.f32.mrb[18].mxu0 }
0x10c9   : > { %v1523_v55 = vadd.f32 %v1522_v54, %v5215_v17  ;;  %v3758_v56 = vpop.f32.mrb[19].mxu0 }
0x10cb   : > { %v1526_v57 = vmax.f32 %v1523_v55, 0.0 }
0x10cd   : > { %v1527_v58 = vsub.f32 %v1526_v57, %v1455_v51 }
0x10cf   : > { %v1528_v59 = vmul.f32 %v1527_v58, %v5380_v53  ;;  %v1606_v60 = vmul.f32 %v1527_v58, %v5354_v42 }
0x10d1   : > { %v1529_v61 = vadd.f32 %v1528_v59, %v5678_v31  ;;  %v1607_v62 = vadd.f32 %v1606_v60, %v1605_v52 }
0x10d3   : > { %3792 = vmatmul.mubr.f32.vlgmr.msra.gmra.mrb[18].mxu1 %v1529_v61 }
0x10d4   : > { %4720 = vmatpush3.bf16.msra.mxu1 %v5229_v18  ;;  %3861 = vmatprep.mubr.msk.f32.mxu1 %vm5113_vm0, %v5114_v21 }
0x10d5   : > { %4721 = vmatprep.subr.bf16.mxu1 %v5112_v19 }
0x10d8   : > { %4723 = vmatpush3.bf16.msra.mxu1 %v5235_v20 }
0x10d9   : > { %4724 = vmatprep.subr.bf16.mxu1 %v5112_v19 }
0x10dc   : > { %4726 = vmatpush3.bf16.msra.mxu1 %v5248_v22 }
0x10dd   : > { %4727 = vmatprep.subr.bf16.mxu1 %v5112_v19 }
0x10e0   : > { %4729 = vmatpush3.bf16.msra.mxu1 %v5256_v23 }
0x10e1   : > { %4730 = vmatprep.subr.bf16.mxu1 %v5112_v19 }
0x10e4   : > { %4732 = vmatpush3.bf16.msra.mxu1 %v5264_v24 }
0x10e5   : > { %4733 = vmatprep.subr.bf16.mxu1 %v5112_v19 }
0x10e8   : > { %4735 = vmatpush3.bf16.msra.mxu1 %v5272_v25 }
0x10e9   : > { %4736 = vmatprep.subr.bf16.mxu1 %v5112_v19 }
0x10ec   : > { %4738 = vmatpush3.bf16.msra.mxu1 %v5280_v26 }
0x10ed   : > { %4739 = vmatprep.subr.bf16.mxu1 %v5112_v19 }
0x10f0   : > { %4741 = vmatpush3.bf16.msra.mxu1 %v5288_v27 }
0x10f1   : > { %4766 = vmatprep.subr.bf16.mxu1 %v5112_v19 }
0x11a6   : > { %v1596_v63 = vpop.f32.mrb[18].mxu1 }
0x11a7   : > { %v1597_v0 = vadd.f32 %v1596_v63, %v5215_v17  ;;  %v3793_v28 = vpop.f32.mrb[19].mxu1 }
0x11a9   : > { %v1600_v29 = vmax.f32 %v1597_v0, 0.0 }
0x11ab   : > { %v1601_v30 = vsub.f32 %v1600_v29, %v1529_v61 }
0x11ad   : > { %v1608_v31 = vmul.f32 %v1601_v30, %v5349_v36 }
0x11af   : > { %v5769_v33 = vadd.f32 %v1608_v31, %v1607_v62 }
0x11b1   : > { %3827 = vmatmul.mubr.f32.vlgmr.msra.gmra.mrb[20].mxu0 %v5769_v33 }
0x11b2   : > { %4744 = vmatpush3.bf16.msra.mxu0 %v5229_v18  ;;  %3896 = vmatprep.mubr.msk.f32.mxu0 %vm5113_vm0, %v5114_v21 }
0x11b3   : > { %4745 = vmatprep.subr.bf16.mxu0 %v5112_v19 }
0x11b6   : > { %4747 = vmatpush3.bf16.msra.mxu0 %v5235_v20 }
0x11b7   : > { %4748 = vmatprep.subr.bf16.mxu0 %v5112_v19 }
0x11ba   : > { %4750 = vmatpush3.bf16.msra.mxu0 %v5248_v22 }
0x11bb   : > { %4751 = vmatprep.subr.bf16.mxu0 %v5112_v19 }
0x11be   : > { %4753 = vmatpush3.bf16.msra.mxu0 %v5256_v23 }
0x11bf   : > { %4754 = vmatprep.subr.bf16.mxu0 %v5112_v19 }
0x11c2   : > { %4756 = vmatpush3.bf16.msra.mxu0 %v5264_v24 }
0x11c3   : > { %4757 = vmatprep.subr.bf16.mxu0 %v5112_v19 }
0x11c6   : > { %4759 = vmatpush3.bf16.msra.mxu0 %v5272_v25 }
0x11c7   : > { %4760 = vmatprep.subr.bf16.mxu0 %v5112_v19 }
0x11ca   : > { %4762 = vmatpush3.bf16.msra.mxu0 %v5280_v26 }
0x11cb   : > { %4763 = vmatprep.subr.bf16.mxu0 %v5112_v19 }
0x11ce   : > { %4765 = vmatpush3.bf16.msra.mxu0 %v5288_v27 }
0x11cf   : > { %4790 = vmatprep.subr.bf16.mxu0 %v5112_v19 }
0x1284   : > { %v1676_v34 = vpop.f32.mrb[20].mxu0 }
0x1285   : > { %v1677_v35 = vadd.f32 %v1676_v34, %v5215_v17  ;;  %v3828_v37 = vpop.f32.mrb[21].mxu0 }
0x1287   : > { %v1680_v38 = vmax.f32 %v1677_v35, 0.0 }
0x1289   : > { %v1681_v39 = vsub.f32 %v1680_v38, %v5769_v33 }
0x128b   : > { %v1682_v40 = vmul.f32 %v1681_v39, %v5325_v32  ;;  %v1904_v46 = vmul.f32 %v1681_v39, %v5349_v36 }
0x128d   : > { %v1683_v41 = vadd.f32 %v1682_v40, %v5769_v33  ;;  %v1905_v49 = vadd.f32 %v1904_v46, %v5769_v33 }
0x128f   : > { %3862 = vmatmul.mubr.f32.vlgmr.msra.gmra.mrb[20].mxu1 %v1683_v41 }
0x1290   : > { %4768 = vmatpush3.bf16.msra.mxu1 %v5229_v18  ;;  %3931 = vmatprep.mubr.msk.f32.mxu1 %vm5113_vm0, %v5114_v21 }
0x1291   : > { %4769 = vmatprep.subr.bf16.mxu1 %v5112_v19 }
0x1294   : > { %4771 = vmatpush3.bf16.msra.mxu1 %v5235_v20 }
0x1295   : > { %4772 = vmatprep.subr.bf16.mxu1 %v5112_v19 }
0x1298   : > { %4774 = vmatpush3.bf16.msra.mxu1 %v5248_v22 }
0x1299   : > { %4775 = vmatprep.subr.bf16.mxu1 %v5112_v19 }
0x129c   : > { %4777 = vmatpush3.bf16.msra.mxu1 %v5256_v23 }
0x129d   : > { %4778 = vmatprep.subr.bf16.mxu1 %v5112_v19 }
0x12a0   : > { %4780 = vmatpush3.bf16.msra.mxu1 %v5264_v24 }
0x12a1   : > { %4781 = vmatprep.subr.bf16.mxu1 %v5112_v19 }
0x12a4   : > { %4783 = vmatpush3.bf16.msra.mxu1 %v5272_v25 }
0x12a5   : > { %4784 = vmatprep.subr.bf16.mxu1 %v5112_v19 }
0x12a8   : > { %4786 = vmatpush3.bf16.msra.mxu1 %v5280_v26 }
0x12a9   : > { %4787 = vmatprep.subr.bf16.mxu1 %v5112_v19 }
0x12ac   : > { %4789 = vmatpush3.bf16.msra.mxu1 %v5288_v27 }
0x12ad   : > { %4814 = vmatprep.subr.bf16.mxu1 %v5112_v19 }
0x1362   : > { %v1750_v43 = vpop.f32.mrb[20].mxu1 }
0x1363   : > { %v1751_v44 = vadd.f32 %v1750_v43, %v5215_v17  ;;  %v3863_v45 = vpop.f32.mrb[21].mxu1 }
0x1365   : > { %v1754_v47 = vmax.f32 %v1751_v44, 0.0 }
0x1367   : > { %v1755_v48 = vsub.f32 %v1754_v47, %v1683_v41 }
0x1369   : > { %v1756_v50 = vmul.f32 %v1755_v48, %v5325_v32  ;;  %v1906_v51 = vmul.f32 %v1755_v48, %v5354_v42 }
0x136b   : > { %v1757_v52 = vadd.f32 %v1756_v50, %v5769_v33  ;;  %v1907_v54 = vadd.f32 %v1906_v51, %v1905_v49 }
0x136d   : > { %3897 = vmatmul.mubr.f32.vlgmr.msra.gmra.mrb[22].mxu0 %v1757_v52 }
0x136e   : > { %4792 = vmatpush3.bf16.msra.mxu0 %v5229_v18  ;;  %3966 = vmatprep.mubr.msk.f32.mxu0 %vm5113_vm0, %v5114_v21 }
0x136f   : > { %4793 = vmatprep.subr.bf16.mxu0 %v5112_v19 }
0x1372   : > { %4795 = vmatpush3.bf16.msra.mxu0 %v5235_v20 }
0x1373   : > { %4796 = vmatprep.subr.bf16.mxu0 %v5112_v19 }
0x1376   : > { %4798 = vmatpush3.bf16.msra.mxu0 %v5248_v22 }
0x1377   : > { %4799 = vmatprep.subr.bf16.mxu0 %v5112_v19 }
0x137a   : > { %4801 = vmatpush3.bf16.msra.mxu0 %v5256_v23 }
0x137b   : > { %4802 = vmatprep.subr.bf16.mxu0 %v5112_v19 }
0x137e   : > { %4804 = vmatpush3.bf16.msra.mxu0 %v5264_v24 }
0x137f   : > { %4805 = vmatprep.subr.bf16.mxu0 %v5112_v19 }
0x1382   : > { %4807 = vmatpush3.bf16.msra.mxu0 %v5272_v25 }
0x1383   : > { %4808 = vmatprep.subr.bf16.mxu0 %v5112_v19 }
0x1386   : > { %4810 = vmatpush3.bf16.msra.mxu0 %v5280_v26 }
0x1387   : > { %4811 = vmatprep.subr.bf16.mxu0 %v5112_v19 }
0x138a   : > { %4813 = vmatpush3.bf16.msra.mxu0 %v5288_v27 }
0x138b   : > { %4838 = vmatprep.subr.bf16.mxu0 %v5112_v19 }
0x1440   : > { %v1824_v55 = vpop.f32.mrb[22].mxu0 }
0x1441   : > { %v1825_v56 = vadd.f32 %v1824_v55, %v5215_v17  ;;  %v3898_v57 = vpop.f32.mrb[23].mxu0 }
0x1443   : > { %v1828_v58 = vmax.f32 %v1825_v56, 0.0 }
0x1445   : > { %v1829_v59 = vsub.f32 %v1828_v58, %v1757_v52 }
0x1447   : > { %v1830_v60 = vmul.f32 %v1829_v59, %v5380_v53  ;;  %v1908_v61 = vmul.f32 %v1829_v59, %v5354_v42 }
0x1449   : > { %v1831_v62 = vadd.f32 %v1830_v60, %v5769_v33  ;;  %v1909_v63 = vadd.f32 %v1908_v61, %v1907_v54 }
0x144b   : > { %3932 = vmatmul.mubr.f32.vlgmr.msra.gmra.mrb[22].mxu1 %v1831_v62 }
0x144c   : > { %4816 = vmatpush3.bf16.msra.mxu1 %v5229_v18  ;;  %4001 = vmatprep.mubr.msk.f32.mxu1 %vm5113_vm0, %v5114_v21 }
0x144d   : > { %4817 = vmatprep.subr.bf16.mxu1 %v5112_v19 }
0x1450   : > { %4819 = vmatpush3.bf16.msra.mxu1 %v5235_v20 }
0x1451   : > { %4820 = vmatprep.subr.bf16.mxu1 %v5112_v19 }
0x1454   : > { %4822 = vmatpush3.bf16.msra.mxu1 %v5248_v22 }
0x1455   : > { %4823 = vmatprep.subr.bf16.mxu1 %v5112_v19 }
0x1458   : > { %4825 = vmatpush3.bf16.msra.mxu1 %v5256_v23 }
0x1459   : > { %4826 = vmatprep.subr.bf16.mxu1 %v5112_v19 }
0x145c   : > { %4828 = vmatpush3.bf16.msra.mxu1 %v5264_v24 }
0x145d   : > { %4829 = vmatprep.subr.bf16.mxu1 %v5112_v19 }
0x1460   : > { %4831 = vmatpush3.bf16.msra.mxu1 %v5272_v25 }
0x1461   : > { %4832 = vmatprep.subr.bf16.mxu1 %v5112_v19 }
0x1464   : > { %4834 = vmatpush3.bf16.msra.mxu1 %v5280_v26 }
0x1465   : > { %4835 = vmatprep.subr.bf16.mxu1 %v5112_v19 }
0x1468   : > { %4837 = vmatpush3.bf16.msra.mxu1 %v5288_v27 }
0x1469   : > { %4862 = vmatprep.subr.bf16.mxu1 %v5112_v19 }
0x151e   : > { %v1898_v0 = vpop.f32.mrb[22].mxu1 }
0x151f   : > { %v1899_v28 = vadd.f32 %v1898_v0, %v5215_v17  ;;  %v3933_v29 = vpop.f32.mrb[23].mxu1 }
0x1521   : > { %v1902_v30 = vmax.f32 %v1899_v28, 0.0 }
0x1523   : > { %v1903_v31 = vsub.f32 %v1902_v30, %v1831_v62 }
0x1525   : > { %v1910_v33 = vmul.f32 %v1903_v31, %v5349_v36 }
0x1527   : > { %v5860_v34 = vadd.f32 %v1910_v33, %v1909_v63 }
0x1529   : > { %3967 = vmatmul.mubr.f32.vlgmr.msra.gmra.mrb[24].mxu0 %v5860_v34 }
0x152a   : > { %4840 = vmatpush3.bf16.msra.mxu0 %v5229_v18  ;;  %4036 = vmatprep.mubr.msk.f32.mxu0 %vm5113_vm0, %v5114_v21 }
0x152b   : > { %4841 = vmatprep.subr.bf16.mxu0 %v5112_v19 }
0x152e   : > { %4843 = vmatpush3.bf16.msra.mxu0 %v5235_v20 }
0x152f   : > { %4844 = vmatprep.subr.bf16.mxu0 %v5112_v19 }
0x1532   : > { %4846 = vmatpush3.bf16.msra.mxu0 %v5248_v22 }
0x1533   : > { %4847 = vmatprep.subr.bf16.mxu0 %v5112_v19 }
0x1536   : > { %4849 = vmatpush3.bf16.msra.mxu0 %v5256_v23 }
0x1537   : > { %4850 = vmatprep.subr.bf16.mxu0 %v5112_v19 }
0x153a   : > { %4852 = vmatpush3.bf16.msra.mxu0 %v5264_v24 }
0x153b   : > { %4853 = vmatprep.subr.bf16.mxu0 %v5112_v19 }
0x153e   : > { %4855 = vmatpush3.bf16.msra.mxu0 %v5272_v25 }
0x153f   : > { %4856 = vmatprep.subr.bf16.mxu0 %v5112_v19 }
0x1542   : > { %4858 = vmatpush3.bf16.msra.mxu0 %v5280_v26 }
0x1543   : > { %4859 = vmatprep.subr.bf16.mxu0 %v5112_v19 }
0x1546   : > { %4861 = vmatpush3.bf16.msra.mxu0 %v5288_v27 }
0x1547   : > { %4886 = vmatprep.subr.bf16.mxu0 %v5112_v19 }
0x15fc   : > { %v1978_v35 = vpop.f32.mrb[24].mxu0 }
0x15fd   : > { %v1979_v37 = vadd.f32 %v1978_v35, %v5215_v17  ;;  %v3968_v38 = vpop.f32.mrb[25].mxu0 }
0x15ff   : > { %v1982_v39 = vmax.f32 %v1979_v37, 0.0 }
0x1601   : > { %v1983_v40 = vsub.f32 %v1982_v39, %v5860_v34 }
0x1603   : > { %v1984_v41 = vmul.f32 %v1983_v40, %v5325_v32  ;;  %v2206_v47 = vmul.f32 %v1983_v40, %v5349_v36 }
0x1605   : > { %v1985_v43 = vadd.f32 %v1984_v41, %v5860_v34  ;;  %v2207_v50 = vadd.f32 %v2206_v47, %v5860_v34 }
0x1607   : > { %4002 = vmatmul.mubr.f32.vlgmr.msra.gmra.mrb[24].mxu1 %v1985_v43 }
0x1608   : > { %4864 = vmatpush3.bf16.msra.mxu1 %v5229_v18  ;;  %4071 = vmatprep.mubr.msk.f32.mxu1 %vm5113_vm0, %v5114_v21 }
0x1609   : > { %4865 = vmatprep.subr.bf16.mxu1 %v5112_v19 }
0x160c   : > { %4867 = vmatpush3.bf16.msra.mxu1 %v5235_v20 }
0x160d   : > { %4868 = vmatprep.subr.bf16.mxu1 %v5112_v19 }
0x1610   : > { %4870 = vmatpush3.bf16.msra.mxu1 %v5248_v22 }
0x1611   : > { %4871 = vmatprep.subr.bf16.mxu1 %v5112_v19 }
0x1614   : > { %4873 = vmatpush3.bf16.msra.mxu1 %v5256_v23 }
0x1615   : > { %4874 = vmatprep.subr.bf16.mxu1 %v5112_v19 }
0x1618   : > { %4876 = vmatpush3.bf16.msra.mxu1 %v5264_v24 }
0x1619   : > { %4877 = vmatprep.subr.bf16.mxu1 %v5112_v19 }
0x161c   : > { %4879 = vmatpush3.bf16.msra.mxu1 %v5272_v25 }
0x161d   : > { %4880 = vmatprep.subr.bf16.mxu1 %v5112_v19 }
0x1620   : > { %4882 = vmatpush3.bf16.msra.mxu1 %v5280_v26 }
0x1621   : > { %4883 = vmatprep.subr.bf16.mxu1 %v5112_v19 }
0x1624   : > { %4885 = vmatpush3.bf16.msra.mxu1 %v5288_v27 }
0x1625   : > { %4910 = vmatprep.subr.bf16.mxu1 %v5112_v19 }
0x16da   : > { %v2052_v44 = vpop.f32.mrb[24].mxu1 }
0x16db   : > { %v2053_v45 = vadd.f32 %v2052_v44, %v5215_v17  ;;  %v4003_v46 = vpop.f32.mrb[25].mxu1 }
0x16dd   : > { %v2056_v48 = vmax.f32 %v2053_v45, 0.0 }
0x16df   : > { %v2057_v49 = vsub.f32 %v2056_v48, %v1985_v43 }
0x16e1   : > { %v2058_v51 = vmul.f32 %v2057_v49, %v5325_v32  ;;  %v2208_v52 = vmul.f32 %v2057_v49, %v5354_v42 }
0x16e3   : > { %v2059_v54 = vadd.f32 %v2058_v51, %v5860_v34  ;;  %v2209_v55 = vadd.f32 %v2208_v52, %v2207_v50 }
0x16e5   : > { %4037 = vmatmul.mubr.f32.vlgmr.msra.gmra.mrb[26].mxu0 %v2059_v54 }
0x16e6   : > { %4888 = vmatpush3.bf16.msra.mxu0 %v5229_v18  ;;  %4106 = vmatprep.mubr.msk.f32.mxu0 %vm5113_vm0, %v5114_v21 }
0x16e7   : > { %4889 = vmatprep.subr.bf16.mxu0 %v5112_v19 }
0x16ea   : > { %4891 = vmatpush3.bf16.msra.mxu0 %v5235_v20 }
0x16eb   : > { %4892 = vmatprep.subr.bf16.mxu0 %v5112_v19 }
0x16ee   : > { %4894 = vmatpush3.bf16.msra.mxu0 %v5248_v22 }
0x16ef   : > { %4895 = vmatprep.subr.bf16.mxu0 %v5112_v19 }
0x16f2   : > { %4897 = vmatpush3.bf16.msra.mxu0 %v5256_v23 }
0x16f3   : > { %4898 = vmatprep.subr.bf16.mxu0 %v5112_v19 }
0x16f6   : > { %4900 = vmatpush3.bf16.msra.mxu0 %v5264_v24 }
0x16f7   : > { %4901 = vmatprep.subr.bf16.mxu0 %v5112_v19 }
0x16fa   : > { %4903 = vmatpush3.bf16.msra.mxu0 %v5272_v25 }
0x16fb   : > { %4904 = vmatprep.subr.bf16.mxu0 %v5112_v19 }
0x16fe   : > { %4906 = vmatpush3.bf16.msra.mxu0 %v5280_v26 }
0x16ff   : > { %4907 = vmatprep.subr.bf16.mxu0 %v5112_v19 }
0x1702   : > { %4909 = vmatpush3.bf16.msra.mxu0 %v5288_v27 }
0x1703   : > { %4934 = vmatprep.subr.bf16.mxu0 %v5112_v19 }
0x17b8   : > { %v2126_v56 = vpop.f32.mrb[26].mxu0 }
0x17b9   : > { %v2127_v57 = vadd.f32 %v2126_v56, %v5215_v17  ;;  %v4038_v58 = vpop.f32.mrb[27].mxu0 }
0x17bb   : > { %v2130_v59 = vmax.f32 %v2127_v57, 0.0 }
0x17bd   : > { %v2131_v60 = vsub.f32 %v2130_v59, %v2059_v54 }
0x17bf   : > { %v2132_v61 = vmul.f32 %v2131_v60, %v5380_v53  ;;  %v2210_v62 = vmul.f32 %v2131_v60, %v5354_v42 }
0x17c1   : > { %v2133_v63 = vadd.f32 %v2132_v61, %v5860_v34  ;;  %v2211_v0 = vadd.f32 %v2210_v62, %v2209_v55 }
0x17c3   : > { %4072 = vmatmul.mubr.f32.vlgmr.msra.gmra.mrb[26].mxu1 %v2133_v63 }
0x17c4   : > { %4912 = vmatpush3.bf16.msra.mxu1 %v5229_v18  ;;  %4141 = vmatprep.mubr.msk.f32.mxu1 %vm5113_vm0, %v5114_v21 }
0x17c5   : > { %4913 = vmatprep.subr.bf16.mxu1 %v5112_v19 }
0x17c8   : > { %4915 = vmatpush3.bf16.msra.mxu1 %v5235_v20 }
0x17c9   : > { %4916 = vmatprep.subr.bf16.mxu1 %v5112_v19 }
0x17cc   : > { %4918 = vmatpush3.bf16.msra.mxu1 %v5248_v22 }
0x17cd   : > { %4919 = vmatprep.subr.bf16.mxu1 %v5112_v19 }
0x17d0   : > { %4921 = vmatpush3.bf16.msra.mxu1 %v5256_v23 }
0x17d1   : > { %4922 = vmatprep.subr.bf16.mxu1 %v5112_v19 }
0x17d4   : > { %4924 = vmatpush3.bf16.msra.mxu1 %v5264_v24 }
0x17d5   : > { %4925 = vmatprep.subr.bf16.mxu1 %v5112_v19 }
0x17d8   : > { %4927 = vmatpush3.bf16.msra.mxu1 %v5272_v25 }
0x17d9   : > { %4928 = vmatprep.subr.bf16.mxu1 %v5112_v19 }
0x17dc   : > { %4930 = vmatpush3.bf16.msra.mxu1 %v5280_v26 }
0x17dd   : > { %4931 = vmatprep.subr.bf16.mxu1 %v5112_v19 }
0x17e0   : > { %4933 = vmatpush3.bf16.msra.mxu1 %v5288_v27 }
0x17e1   : > { %4958 = vmatprep.subr.bf16.mxu1 %v5112_v19 }
0x1896   : > { %v2200_v28 = vpop.f32.mrb[26].mxu1 }
0x1897   : > { %v2201_v29 = vadd.f32 %v2200_v28, %v5215_v17  ;;  %v4073_v30 = vpop.f32.mrb[27].mxu1 }
0x1899   : > { %v2204_v31 = vmax.f32 %v2201_v29, 0.0 }
0x189b   : > { %v2205_v33 = vsub.f32 %v2204_v31, %v2133_v63 }
0x189d   : > { %v2212_v34 = vmul.f32 %v2205_v33, %v5349_v36 }
0x189f   : > { %v2213_v35 = vadd.f32 %v2212_v34, %v2211_v0 }
0x18a1   : > { %4107 = vmatmul.mubr.f32.vlgmr.msra.gmra.mrb[28].mxu0 %v2213_v35 }
0x18a2   : > { %4936 = vmatpush3.bf16.msra.mxu0 %v5229_v18  ;;  %4176 = vmatprep.mubr.msk.f32.mxu0 %vm5113_vm0, %v5114_v21 }
0x18a3   : > { %4937 = vmatprep.subr.bf16.mxu0 %v5112_v19 }
0x18a6   : > { %4939 = vmatpush3.bf16.msra.mxu0 %v5235_v20 }
0x18a7   : > { %4940 = vmatprep.subr.bf16.mxu0 %v5112_v19 }
0x18aa   : > { %4942 = vmatpush3.bf16.msra.mxu0 %v5248_v22 }
0x18ab   : > { %4943 = vmatprep.subr.bf16.mxu0 %v5112_v19 }
0x18ae   : > { %4945 = vmatpush3.bf16.msra.mxu0 %v5256_v23 }
0x18af   : > { %4946 = vmatprep.subr.bf16.mxu0 %v5112_v19 }
0x18b2   : > { %4948 = vmatpush3.bf16.msra.mxu0 %v5264_v24 }
0x18b3   : > { %4949 = vmatprep.subr.bf16.mxu0 %v5112_v19 }
0x18b6   : > { %4951 = vmatpush3.bf16.msra.mxu0 %v5272_v25 }
0x18b7   : > { %4952 = vmatprep.subr.bf16.mxu0 %v5112_v19 }
0x18ba   : > { %4954 = vmatpush3.bf16.msra.mxu0 %v5280_v26 }
0x18bb   : > { %4955 = vmatprep.subr.bf16.mxu0 %v5112_v19 }
0x18be   : > { %4957 = vmatpush3.bf16.msra.mxu0 %v5288_v27 }
0x1974   : > { %v2280_v37 = vpop.f32.mrb[28].mxu0 }
0x1975   : > { %v2281_v38 = vadd.f32 %v2280_v37, %v5215_v17  ;;  %v4108_v39 = vpop.f32.mrb[29].mxu0 }
0x1977   : > { %v2284_v40 = vmax.f32 %v2281_v38, 0.0 }
0x1979   : > { %v2285_v41 = vsub.f32 %v2284_v40, %v2213_v35 }
0x197b   : > { %v2286_v43 = vmul.f32 %v2285_v41, %v5325_v32 }
0x197d   : > { %v2287_v44 = vadd.f32 %v2286_v43, %v2213_v35 }
0x197f   : > { %4142 = vmatmul.mubr.f32.vlgmr.msra.gmra.mrb[28].mxu1 %v2287_v44 }
0x1980   : > { %4960 = vmatpush3.bf16.msra.mxu1 %v5229_v18  ;;  %4211 = vmatprep.mubr.msk.f32.mxu1 %vm5113_vm0, %v5114_v21 }
0x1981   : > { %4961 = vmatprep.subr.bf16.mxu1 %v5112_v19 }
0x1984   : > { %4963 = vmatpush3.bf16.msra.mxu1 %v5235_v20 }
0x1985   : > { %4964 = vmatprep.subr.bf16.mxu1 %v5112_v19 }
0x1988   : > { %4966 = vmatpush3.bf16.msra.mxu1 %v5248_v22  ;;  %v2508_v22 = vmul.f32 %v2285_v41, %v5349_v36 }
0x1989   : > { %4967 = vmatprep.subr.bf16.mxu1 %v5112_v19 }
0x198a   : > { %v2509_v45 = vadd.f32 %v2508_v22, %v2213_v35 }
0x198c   : > { %4969 = vmatpush3.bf16.msra.mxu1 %v5256_v23 }
0x198d   : > { %4970 = vmatprep.subr.bf16.mxu1 %v5112_v19 }
0x1990   : > { %4972 = vmatpush3.bf16.msra.mxu1 %v5264_v24 }
0x1991   : > { %4973 = vmatprep.subr.bf16.mxu1 %v5112_v19 }
0x1994   : > { %4975 = vmatpush3.bf16.msra.mxu1 %v5272_v25 }
0x1995   : > { %4976 = vmatprep.subr.bf16.mxu1 %v5112_v19 }
0x1998   : > { %4978 = vmatpush3.bf16.msra.mxu1 %v5280_v26 }
0x1999   : > { %4979 = vmatprep.subr.bf16.mxu1 %v5112_v19 }
0x199c   : > { %4981 = vmatpush3.bf16.msra.mxu1 %v5288_v27 }
0x1a52   : > { %v2354_v18 = vpop.f32.mrb[28].mxu1 }
0x1a53   : > { %v2355_v20 = vadd.f32 %v2354_v18, %v5215_v17  ;;  %v4143_v21 = vpop.f32.mrb[29].mxu1 }
0x1a55   : > { %v2358_v23 = vmax.f32 %v2355_v20, 0.0 }
0x1a57   : > { %v2359_v24 = vsub.f32 %v2358_v23, %v2287_v44 }
0x1a59   : > { %v2360_v46 = vmul.f32 %v2359_v24, %v5325_v32  ;;  %v2510_v25 = vmul.f32 %v2359_v24, %v5354_v42 }
0x1a5b   : > { %v2361_v47 = vadd.f32 %v2360_v46, %v2213_v35  ;;  %v2511_v48 = vadd.f32 %v2510_v25, %v2509_v45 }
0x1a5d   : > { %4177 = vmatmul.mubr.f32.vlgmr.msra.gmra.mrb[30].mxu0 %v2361_v47 }
0x1b30   : > { %v2428_v19 = vpop.f32.mrb[30].mxu0 }
0x1b31   : > { %v2429_v26 = vadd.f32 %v2428_v19, %v5215_v17  ;;  %v4178_v27 = vpop.f32.mrb[31].mxu0 }
0x1b33   : > { %v2432_v49 = vmax.f32 %v2429_v26, 0.0 }
0x1b35   : > { %v2433_v50 = vsub.f32 %v2432_v49, %v2361_v47 }
0x1b37   : > { %v2434_v51 = vmul.f32 %v2433_v50, %v5380_v53  ;;  %v2512_v52 = vmul.f32 %v2433_v50, %v5354_v42 }
0x1b39   : > { %v2435_v54 = vadd.f32 %v2434_v51, %v2213_v35  ;;  %v2513_v55 = vadd.f32 %v2512_v52, %v2511_v48 }
0x1b3b   : > { %4212 = vmatmul.mubr.f32.vlgmr.msra.gmra.mrb[30].mxu1 %v2435_v54 }
0x1c0e   : > { %v2502_v32 = vpop.f32.mrb[30].mxu1 }
0x1c0f   : > { %v2503_v56 = vadd.f32 %v2502_v32, %v5215_v17  ;;  %v4213_v57 = vpop.f32.mrb[31].mxu1 }
0x1c11   : > { %v2506_v58 = vmax.f32 %v2503_v56, 0.0 }
0x1c13   : > { %v2507_v59 = vsub.f32 %v2506_v58, %v2435_v54  ;;  %83 = sbr.rel (!%p81_p5) target bundleno = 56 (0x38), region = 60 }
0x1c15   : > { %v2514_v60 = vmul.f32 %v2507_v59, %v5349_v36 }
0x1c17   : > { %v2515_v0 = vadd.f32 %v2514_v60, %v2513_v55  }
0x1c19   : > { %2518 = vst [vmem:[%s2517_s7] sm:$0xff] %v2515_v0 }
0x1c1a   :  { %5072 = shalt.err (!%p5069_p10)
}
0x1c1b   :  { %s5073_s14 = scalar_lea.hbm %s6022_s4, 1024 }
0x1c1c   :  { %p5074_p11 = scmp.ne.s32.totalorder %s6022_s4, %s5073_s14  ;;  %p5077_p12 = scmp.lt.u32.totalorder %s5073_s14, %s6022_s4 }
0x1c1e   :  { %p5079_p13 = pnand %p5077_p12, %p5074_p11 }
0x1c20   :  { %5082 = shalt.err (!%p5079_p13)
}
0x1c21   :  { %2531 = dma.vmem_to_hbm [thread:$0]  %s2526_s10, 1024, %s6022_s4, [#allocation5], %s5109_s0, %s5109_s0, %s5110_s9  }
0x1c22   :  { %5097 = dma.done.wait [#allocation5], 1024  }
0x1c23   :  { %5098 = vsyncadd [#allocation5], 4294966272 }
0x1c24   :  { %2535 = vsyncpa [#allocation4], 1 }
0x1c25   :  { %2536 = vsyncpa [#allocation9], 1 }
0x1c26   :  { %2537 = vsyncpa [#allocation5], 1 }
0x1c27   :  { %2538 = vsyncpa [#allocation6], 1 }

</bundles_post_ra>
